<compile_context>
chip_gen: v5e
topology: v5e:2x2
jax: 0.10.0
libtpu: 0.0.40
codegen_flags: <defaults>
</compile_context>

<pallas_src>
import jax
import jax.numpy as jnp
from jax.experimental import pallas as pl
from jax.experimental.pallas import tpu as pltpu


def localnet_kernel(x_ref, wa_ref, ba_ref, w1_ref, b1_ref, w2_ref, b2_ref,
                    w3_ref, b3_ref, adapted_ref, score_ref):
    # x_ref: (TM, F) row tile in the compute dtype; weights resident in VMEM.
    x = x_ref[...]

    # ---- adaptor: Linear(F, F) + LeakyReLU(0.2) (f32 accumulation) ----
    a = jnp.dot(x, wa_ref[...], preferred_element_type=jnp.float32) + ba_ref[...]
    a = jnp.maximum(a, 0.2 * a)                       # LeakyReLU, slope in (0,1)
    adapted_ref[...] = a.astype(adapted_ref.dtype)    # lane-dense (TM, F) store

    # ---- discriminator (stays entirely in VMEM/vregs) ----
    h = jnp.dot(a.astype(w1_ref.dtype), w1_ref[...],
                preferred_element_type=jnp.float32) + b1_ref[...]
    h = jnp.maximum(h, 0.2 * h)
    h = jnp.dot(h.astype(w2_ref.dtype), w2_ref[...],
                preferred_element_type=jnp.float32) + b2_ref[...]
    h = jnp.maximum(h, 0.2 * h)

    # Final Linear(128, 1) on the VPU: multiply by the weight row (1, 128) and
    # lane-reduce.  Avoids a nearly-empty N=1 MXU pass.
    s = jnp.sum(h * w3_ref[...], axis=-1, keepdims=True) + b3_ref[...]   # (TM, 1)
    sig = jax.nn.sigmoid(s)
    # Lane-dense store: broadcast over the 128 lanes; wrapper slices column 0.
    score_ref[...] = jnp.broadcast_to(sig, score_ref.shape).astype(score_ref.dtype)


def localnet_forward(x, params, *, tm=None, compute_dtype=jnp.bfloat16):
    """x: (..., F). Returns (adapted_features: (..., F), score ~ torch .squeeze())."""
    wa, ba, w1, b1, w2, b2, w3, b3 = params
    orig_shape = x.shape
    F = orig_shape[-1]
    H1 = w1.shape[1]
    H2 = w2.shape[1]
    out_dtype = x.dtype

    x2 = x.reshape(-1, F)
    M = x2.shape[0]

    # Row tile: big enough that per-grid-step overhead (~0.35 us) is negligible;
    # multiple of 16 for bf16 sublane packing.  Ragged M handled by padding.
    if tm is None:
        tm = 512 if M >= 512 else max(16, -(-M // 16) * 16)
    tm = max(16, -(-tm // 16) * 16)
    m_pad = pl.cdiv(M, tm) * tm
    if m_pad != M:
        x2 = jnp.pad(x2, ((0, m_pad - M), (0, 0)))

    # MXU operands in the compute dtype (bf16 MXU rate, half the HBM/VMEM
    # traffic); accumulation and bias/activation math stay f32.
    x2 = x2.astype(compute_dtype)
    wa_c = wa.astype(compute_dtype)
    w1_c = w1.astype(compute_dtype)
    w2_c = w2.astype(compute_dtype)
    # Last layer runs on the VPU in f32: pass its weight column as a (1, H2) row.
    w3_r = w3.astype(jnp.float32).reshape(1, H2)

    # Biases as (1, N) f32 rows so they broadcast over the row tile.
    ba2 = ba.astype(jnp.float32).reshape(1, F)
    b12 = b1.astype(jnp.float32).reshape(1, H1)
    b22 = b2.astype(jnp.float32).reshape(1, H2)
    b32 = b3.astype(jnp.float32).reshape(1, 1)

    # ---- VMEM budget: resident weights (x2 buffers) + pipelined tiles ----
    # TODO(synk): for very large len_feature (>= ~2-4k) single-buffer the
    # resident weights (pipeline_mode=pl.Buffered(1)) and/or K-tile with an
    # accumulator; also consider a deeper x-input pipeline on v5e.
    lane_pad = lambda n: -(-n // 128) * 128
    nbytes = lambda a: int(a.size) * jnp.dtype(a.dtype).itemsize
    weight_bytes = sum(nbytes(a) for a in
                       (wa_c, ba2, w1_c, b12, w2_c, b22, w3_r, b32))
    cdt_sz = jnp.dtype(compute_dtype).itemsize
    out_sz = jnp.dtype(out_dtype).itemsize
    tile_bytes = (2 * tm * lane_pad(F) * cdt_sz        # x in (double-buffered)
                  + 2 * tm * lane_pad(F) * out_sz      # adapted out
                  + 2 * tm * 128 * out_sz)             # score slab out
    inter_bytes = tm * (lane_pad(F) + lane_pad(H1) + 2 * lane_pad(H2)) * 4
    need = 2 * weight_bytes + tile_bytes + inter_bytes
    try:
        vmem_cap = int(pltpu.get_tpu_info().vmem_capacity_bytes)
    except Exception:  # conservative fallback if the query is unavailable
        vmem_cap = 64 * 1024 * 1024
    vmem_limit = int(min(max(2 * need, 32 * 1024 * 1024), 0.75 * vmem_cap))

    grid = (m_pad // tm,)
    adapted, score = pl.pallas_call(
        localnet_kernel,
        out_shape=(
            jax.ShapeDtypeStruct((m_pad, F), out_dtype),
            jax.ShapeDtypeStruct((m_pad, 128), out_dtype),
        ),
        grid_spec=pltpu.PrefetchScalarGridSpec(
            num_scalar_prefetch=0,
            grid=grid,
            in_specs=[
                pl.BlockSpec((tm, F), lambda i: (i, 0)),    # x row tile
                pl.BlockSpec((F, F), lambda i: (0, 0)),     # Wa (resident)
                pl.BlockSpec((1, F), lambda i: (0, 0)),     # ba
                pl.BlockSpec((F, H1), lambda i: (0, 0)),    # W1
                pl.BlockSpec((1, H1), lambda i: (0, 0)),    # b1
                pl.BlockSpec((H1, H2), lambda i: (0, 0)),   # W2
                pl.BlockSpec((1, H2), lambda i: (0, 0)),    # b2
                pl.BlockSpec((1, H2), lambda i: (0, 0)),    # W3 as a row
                pl.BlockSpec((1, 1), lambda i: (0, 0)),     # b3
            ],
            out_specs=[
                pl.BlockSpec((tm, F), lambda i: (i, 0)),    # adapted features
                pl.BlockSpec((tm, 128), lambda i: (i, 0)),  # lane-dense score
            ],
        ),
        compiler_params=pltpu.CompilerParams(
            dimension_semantics=("parallel",),
            vmem_limit_bytes=vmem_limit,
        ),
    )(x2, wa_c, ba2, w1_c, b12, w2_c, b22, w3_r, b32)

    adapted = adapted[:M].reshape(orig_shape)
    # torch's .squeeze() drops every size-1 dim of the (..., 1) score tensor.
    score = jnp.squeeze(score[:M, 0].reshape(orig_shape[:-1] + (1,)))
    return adapted, score


def _ref_forward(x, params):
    wa, ba, w1, b1, w2, b2, w3, b3 = params
    a = jax.nn.leaky_relu(x @ wa + ba, 0.2)
    h = jax.nn.leaky_relu(a @ w1 + b1, 0.2)
    h = jax.nn.leaky_relu(h @ w2 + b2, 0.2)
    s = jax.nn.sigmoid(h @ w3 + b3)
    return a, jnp.squeeze(s, axis=-1)


if __name__ == "__main__":
    key = jax.random.PRNGKey(0)
    ks = jax.random.split(key, 9)

    # Small shapes consistent with the module: (B, T, len_feature).
    B, T, F = 2, 16, 256
    H1, H2 = 1024, 128

    x = jax.random.normal(ks[0], (B, T, F), dtype=jnp.float32)

    def init_linear(kw, kb, fan_in, fan_out):
        bound = 1.0 / jnp.sqrt(fan_in)
        w = jax.random.uniform(kw, (fan_in, fan_out), jnp.float32, -bound, bound)
        b = jax.random.uniform(kb, (fan_out,), jnp.float32, -bound, bound)
        return w, b

    wa, ba = init_linear(ks[1], ks[2], F, F)
    w1, b1 = init_linear(ks[3], ks[4], F, H1)
    w2, b2 = init_linear(ks[5], ks[6], H1, H2)
    w3, b3 = init_linear(ks[7], ks[8], H2, 1)
    params = (wa, ba, w1, b1, w2, b2, w3, b3)

    adapted, score = localnet_forward(x, params)
    adapted = jax.block_until_ready(adapted)
    score = jax.block_until_ready(score)

    ref_a, ref_s = _ref_forward(x, params)
    assert adapted.shape == (B, T, F)
    assert score.shape == (B, T)
    # bf16 MXU inputs with f32 accumulation => ~1e-2-level deviation vs f32 ref.
    assert jnp.allclose(adapted, ref_a, atol=3e-2, rtol=3e-2), \
        float(jnp.max(jnp.abs(adapted - ref_a)))
    assert jnp.allclose(score, ref_s, atol=2e-2, rtol=2e-2), \
        float(jnp.max(jnp.abs(score - ref_s)))

    # Ragged row count (B*T not a multiple of the tile): exercises padding path.
    xr = jax.random.normal(ks[0], (3, 7, F), dtype=jnp.float32)
    ar, sr = localnet_forward(xr, params)
    ar = jax.block_until_ready(ar)
    sr = jax.block_until_ready(sr)
    ref_ar, ref_sr = _ref_forward(xr, params)
    assert ar.shape == (3, 7, F) and sr.shape == (3, 7)
    assert jnp.allclose(ar, ref_ar, atol=3e-2, rtol=3e-2)
    assert jnp.allclose(sr, ref_sr, atol=2e-2, rtol=2e-2)

    print("KERNEL_OK")
</pallas_src>

<mosaic_0001>
module attributes {stable_mosaic.version = 11 : i64} {
  func.func @localnet_kernel(%arg0: i32, %arg1: memref<32x256xbf16, #tpu.memory_space<vmem>>, %arg2: memref<256x256xbf16, #tpu.memory_space<vmem>>, %arg3: memref<1x256xf32, #tpu.memory_space<vmem>>, %arg4: memref<256x1024xbf16, #tpu.memory_space<vmem>>, %arg5: memref<1x1024xf32, #tpu.memory_space<vmem>>, %arg6: memref<1024x128xbf16, #tpu.memory_space<vmem>>, %arg7: memref<1x128xf32, #tpu.memory_space<vmem>>, %arg8: memref<1x128xf32, #tpu.memory_space<vmem>>, %arg9: memref<1x1xf32, #tpu.memory_space<vmem>>, %arg10: memref<32x256xf32, #tpu.memory_space<vmem>>, %arg11: memref<32x128xf32, #tpu.memory_space<vmem>>) attributes {dimension_semantics = [#tpu.dimension_semantics<parallel>], iteration_bounds = array<i64: 1>, scalar_prefetch = 0 : i64, scratch_operands = 0 : i64, tpu.core_type = #tpu.core_type<tc>, window_params = [{transform_indices = @transform_0, window_bounds = array<i64: 32, 256>}, {pipeline_mode = #tpu.pipeline_mode<synchronous>, transform_indices = @transform_1, window_bounds = array<i64: 256, 256>}, {pipeline_mode = #tpu.pipeline_mode<synchronous>, transform_indices = @transform_2, window_bounds = array<i64: 1, 256>}, {pipeline_mode = #tpu.pipeline_mode<synchronous>, transform_indices = @transform_3, window_bounds = array<i64: 256, 1024>}, {pipeline_mode = #tpu.pipeline_mode<synchronous>, transform_indices = @transform_4, window_bounds = array<i64: 1, 1024>}, {pipeline_mode = #tpu.pipeline_mode<synchronous>, transform_indices = @transform_5, window_bounds = array<i64: 1024, 128>}, {pipeline_mode = #tpu.pipeline_mode<synchronous>, transform_indices = @transform_6, window_bounds = array<i64: 1, 128>}, {pipeline_mode = #tpu.pipeline_mode<synchronous>, transform_indices = @transform_7, window_bounds = array<i64: 1, 128>}, {pipeline_mode = #tpu.pipeline_mode<synchronous>, transform_indices = @transform_8, window_bounds = array<i64: 1, 1>}, {transform_indices = @transform_9, window_bounds = array<i64: 32, 256>}, {transform_indices = @transform_10, window_bounds = array<i64: 32, 128>}]} {
    %c0 = arith.constant 0 : index
    %c0_0 = arith.constant 0 : index
    %0 = vector.load %arg1[%c0, %c0_0] : memref<32x256xbf16, #tpu.memory_space<vmem>>, vector<32x256xbf16>
    %c0_1 = arith.constant 0 : index
    %c0_2 = arith.constant 0 : index
    %1 = vector.load %arg2[%c0_1, %c0_2] : memref<256x256xbf16, #tpu.memory_space<vmem>>, vector<256x256xbf16>
    %cst = arith.constant dense<0.000000e+00> : vector<32x256xf32>
    %2 = tpu.matmul %0, %1, %cst {dimension_numbers = #tpu.dot_dimension_numbers<[1], [0], [0], [1], [0, 0, 1, 1], [], []>} : vector<32x256xbf16>, vector<256x256xbf16>, vector<32x256xf32> -> vector<32x256xf32>
    %c0_3 = arith.constant 0 : index
    %c0_4 = arith.constant 0 : index
    %3 = vector.load %arg3[%c0_3, %c0_4] : memref<1x256xf32, #tpu.memory_space<vmem>>, vector<1x256xf32>
    %4 = vector.broadcast %3 : vector<1x256xf32> to vector<32x256xf32>
    %5 = arith.addf %2, %4 : vector<32x256xf32>
    %cst_5 = arith.constant 2.000000e-01 : f32
    %6 = vector.broadcast %cst_5 : f32 to vector<32x256xf32>
    %7 = arith.mulf %6, %5 : vector<32x256xf32>
    %8 = arith.maximumf %5, %7 : vector<32x256xf32>
    %c0_6 = arith.constant 0 : index
    %c0_7 = arith.constant 0 : index
    %9 = vector.load %arg10[%c0_6, %c0_7] : memref<32x256xf32, #tpu.memory_space<vmem>>, vector<32x256xf32>
    tpu.vector_store %arg10[%c0_6, %c0_7], %8 {strides = array<i32>} : memref<32x256xf32, #tpu.memory_space<vmem>>, vector<32x256xf32>,
    %10 = arith.truncf %8 : vector<32x256xf32> to vector<32x256xbf16>
    %c0_8 = arith.constant 0 : index
    %c0_9 = arith.constant 0 : index
    %11 = vector.load %arg4[%c0_8, %c0_9] : memref<256x1024xbf16, #tpu.memory_space<vmem>>, vector<256x1024xbf16>
    %cst_10 = arith.constant dense<0.000000e+00> : vector<32x1024xf32>
    %12 = tpu.matmul %10, %11, %cst_10 {dimension_numbers = #tpu.dot_dimension_numbers<[1], [0], [0], [1], [0, 0, 1, 1], [], []>} : vector<32x256xbf16>, vector<256x1024xbf16>, vector<32x1024xf32> -> vector<32x1024xf32>
    %c0_11 = arith.constant 0 : index
    %c0_12 = arith.constant 0 : index
    %13 = vector.load %arg5[%c0_11, %c0_12] : memref<1x1024xf32, #tpu.memory_space<vmem>>, vector<1x1024xf32>
    %14 = vector.broadcast %13 : vector<1x1024xf32> to vector<32x1024xf32>
    %15 = arith.addf %12, %14 : vector<32x1024xf32>
    %cst_13 = arith.constant 2.000000e-01 : f32
    %16 = vector.broadcast %cst_13 : f32 to vector<32x1024xf32>
    %17 = arith.mulf %16, %15 : vector<32x1024xf32>
    %18 = arith.maximumf %15, %17 : vector<32x1024xf32>
    %19 = arith.truncf %18 : vector<32x1024xf32> to vector<32x1024xbf16>
    %c0_14 = arith.constant 0 : index
    %c0_15 = arith.constant 0 : index
    %20 = vector.load %arg6[%c0_14, %c0_15] : memref<1024x128xbf16, #tpu.memory_space<vmem>>, vector<1024x128xbf16>
    %cst_16 = arith.constant dense<0.000000e+00> : vector<32x128xf32>
    %21 = tpu.matmul %19, %20, %cst_16 {dimension_numbers = #tpu.dot_dimension_numbers<[1], [0], [0], [1], [0, 0, 1, 1], [], []>} : vector<32x1024xbf16>, vector<1024x128xbf16>, vector<32x128xf32> -> vector<32x128xf32>
    %c0_17 = arith.constant 0 : index
    %c0_18 = arith.constant 0 : index
    %22 = vector.load %arg7[%c0_17, %c0_18] : memref<1x128xf32, #tpu.memory_space<vmem>>, vector<1x128xf32>
    %23 = vector.broadcast %22 : vector<1x128xf32> to vector<32x128xf32>
    %24 = arith.addf %21, %23 : vector<32x128xf32>
    %cst_19 = arith.constant 2.000000e-01 : f32
    %25 = vector.broadcast %cst_19 : f32 to vector<32x128xf32>
    %26 = arith.mulf %25, %24 : vector<32x128xf32>
    %27 = arith.maximumf %24, %26 : vector<32x128xf32>
    %c0_20 = arith.constant 0 : index
    %c0_21 = arith.constant 0 : index
    %28 = vector.load %arg8[%c0_20, %c0_21] : memref<1x128xf32, #tpu.memory_space<vmem>>, vector<1x128xf32>
    %29 = vector.broadcast %28 : vector<1x128xf32> to vector<32x128xf32>
    %30 = arith.mulf %27, %29 : vector<32x128xf32>
    %cst_22 = arith.constant dense<0.000000e+00> : vector<32xf32>
    %31 = vector.multi_reduction <add>, %30, %cst_22 [1] : vector<32x128xf32> to vector<32xf32>
    %32 = vector.shape_cast %31 : vector<32xf32> to vector<32x1xf32>
    %c0_23 = arith.constant 0 : index
    %c0_24 = arith.constant 0 : index
    %33 = vector.load %arg9[%c0_23, %c0_24] : memref<1x1xf32, #tpu.memory_space<vmem>>, vector<1x1xf32>
    %34 = vector.broadcast %33 : vector<1x1xf32> to vector<32x1xf32>
    %35 = arith.addf %32, %34 : vector<32x1xf32>
    %36 = arith.negf %35 : vector<32x1xf32>
    %37 = math.exp %36 : vector<32x1xf32>
    %cst_25 = arith.constant 1.000000e+00 : f32
    %38 = vector.broadcast %cst_25 : f32 to vector<32x1xf32>
    %39 = arith.addf %38, %37 : vector<32x1xf32>
    %40 = arith.divf %38, %39 : vector<32x1xf32>
    %41 = vector.shape_cast %40 : vector<32x1xf32> to vector<32x1xf32>
    %42 = vector.broadcast %41 : vector<32x1xf32> to vector<32x128xf32>
    %c0_26 = arith.constant 0 : index
    %c0_27 = arith.constant 0 : index
    %43 = vector.load %arg11[%c0_26, %c0_27] : memref<32x128xf32, #tpu.memory_space<vmem>>, vector<32x128xf32>
    tpu.vector_store %arg11[%c0_26, %c0_27], %42 {strides = array<i32>} : memref<32x128xf32, #tpu.memory_space<vmem>>, vector<32x128xf32>,
    return
  }
  func.func @transform_0(%arg0: i32) -> (i32, i32) {
    %c0_i32 = arith.constant 0 : i32
    %c0_i32_0 = arith.constant 0 : i32
    return %arg0, %c0_i32 : i32, i32
  }
  func.func @transform_1(%arg0: i32) -> (i32, i32) {
    %c0_i32 = arith.constant 0 : i32
    %c0_i32_0 = arith.constant 0 : i32
    %c0_i32_1 = arith.constant 0 : i32
    return %c0_i32, %c0_i32_0 : i32, i32
  }
  func.func @transform_2(%arg0: i32) -> (i32, i32) {
    %c0_i32 = arith.constant 0 : i32
    %c0_i32_0 = arith.constant 0 : i32
    %c0_i32_1 = arith.constant 0 : i32
    return %c0_i32, %c0_i32_0 : i32, i32
  }
  func.func @transform_3(%arg0: i32) -> (i32, i32) {
    %c0_i32 = arith.constant 0 : i32
    %c0_i32_0 = arith.constant 0 : i32
    %c0_i32_1 = arith.constant 0 : i32
    return %c0_i32, %c0_i32_0 : i32, i32
  }
  func.func @transform_4(%arg0: i32) -> (i32, i32) {
    %c0_i32 = arith.constant 0 : i32
    %c0_i32_0 = arith.constant 0 : i32
    %c0_i32_1 = arith.constant 0 : i32
    return %c0_i32, %c0_i32_0 : i32, i32
  }
  func.func @transform_5(%arg0: i32) -> (i32, i32) {
    %c0_i32 = arith.constant 0 : i32
    %c0_i32_0 = arith.constant 0 : i32
    %c0_i32_1 = arith.constant 0 : i32
    return %c0_i32, %c0_i32_0 : i32, i32
  }
  func.func @transform_6(%arg0: i32) -> (i32, i32) {
    %c0_i32 = arith.constant 0 : i32
    %c0_i32_0 = arith.constant 0 : i32
    %c0_i32_1 = arith.constant 0 : i32
    return %c0_i32, %c0_i32_0 : i32, i32
  }
  func.func @transform_7(%arg0: i32) -> (i32, i32) {
    %c0_i32 = arith.constant 0 : i32
    %c0_i32_0 = arith.constant 0 : i32
    %c0_i32_1 = arith.constant 0 : i32
    return %c0_i32, %c0_i32_0 : i32, i32
  }
  func.func @transform_8(%arg0: i32) -> (i32, i32) {
    %c0_i32 = arith.constant 0 : i32
    %c0_i32_0 = arith.constant 0 : i32
    %c0_i32_1 = arith.constant 0 : i32
    return %c0_i32, %c0_i32_0 : i32, i32
  }
  func.func @transform_9(%arg0: i32) -> (i32, i32) {
    %c0_i32 = arith.constant 0 : i32
    %c0_i32_0 = arith.constant 0 : i32
    return %arg0, %c0_i32 : i32, i32
  }
  func.func @transform_10(%arg0: i32) -> (i32, i32) {
    %c0_i32 = arith.constant 0 : i32
    %c0_i32_0 = arith.constant 0 : i32
    return %arg0, %c0_i32 : i32, i32
  }
}

</mosaic_0001>

<bundles_post_ra>
// kernel: tpu_custom_call.1
= control target key start
LH: loop header
LB: loop body
LE: loop exit
PB: predicated region body
PF: predicated region fallthrough
CT: control target
= control target key end

     0   :  { %s4016_s0 = inlined_call_operand.hbm [shape: bf16[32,256], index: 0, kind: input, shape index: {}]   ;;  %s4017_s1 = inlined_call_operand.hbm [shape: bf16[256,256], index: 1, kind: input, shape index: {}]   ;;  %s4018_s2 = inlined_call_operand.vmem [shape: f32[1,256], index: 2, kind: input, shape index: {}]   ;;  %s4019_s3 = inlined_call_operand.hbm [shape: bf16[256,1024], index: 3, kind: input, shape index: {}]   ;;  %s4020_s4 = inlined_call_operand.hbm [shape: f32[1,1024], index: 4, kind: input, shape index: {}]   ;;  %s4021_s5 = inlined_call_operand.hbm [shape: bf16[1024,128], index: 5, kind: input, shape index: {}]   ;;  %s4022_s6 = inlined_call_operand.vmem [shape: f32[1,128], index: 6, kind: input, shape index: {}]   ;;  %s4023_s7 = inlined_call_operand.vmem [shape: f32[1,128], index: 7, kind: input, shape index: {}]   ;;  %s4024_s8 = inlined_call_operand.<no memory space> [shape: f32[1,1], index: 8, kind: input, shape index: {}]   ;;  %s4025_s9 = inlined_call_operand.hbm [shape: f32[32,256], index: 9, kind: output, shape index: {0}]   ;;  %s4026_s10 = inlined_call_operand.hbm [shape: f32[32,128], index: 10, kind: output, shape index: {1}]  }
   0x1   :  { %v16_v0 = vstv %s4024_s8 }
   0x2   :  { %17 = vst [vmem:[#allocation2] sm:$0x1] %v16_v0 }
   0x3   :  { %18 = vsyncpa [#allocation4], 0 }
   0x4   :  { %19 = vsyncpa [#allocation7], 0 }
   0x5   :  { %20 = vsyncpa [#allocation10], 0 }
   0x6   :  { %21 = vsyncpa [#allocation5], 0 }
   0x7   :  { %22 = vsyncpa [#allocation14], 0  ;;  %s40_s17 = sshll.u32 %s4017_s1, 4  ;;  %s3809_s18 = smov [#allocation6]   ;;  %s41_s17 = int_to_ptr.hbm [resolvable:$true] %s40_s17 }
   0x8   :  { %s42_s19 = sshll.u32 %s3809_s18, 4  ;;  %s69_s22 = sshll.u32 %s4020_s4, 4  ;;  %s43_s19 = int_to_ptr.vmem [resolvable:$true] %s42_s19  ;;  %s70_s22 = int_to_ptr.hbm [resolvable:$true] %s69_s22 }
   0x9   :  { %s3810_s23 = smov 128   ;;  %s3811_s8 = smov 8  }
   0xa   :  { %48 = dma.hbm_to_vmem [thread:$0]  %s41_s17, 4096, %s43_s19, [#allocation7], %s3810_s23, %s3810_s23, %s3811_s8  }
   0xb   :  { %s3812_s24 = smov [#allocation9]   ;;  %s27_s1 = sshll.u32 %s4016_s0, 4  ;;  %s28_s1 = int_to_ptr.hbm [resolvable:$true] %s27_s1 }
   0xc   :  { %s71_s25 = sshll.u32 %s3812_s24, 4  ;;  %s55_s4 = sshll.u32 %s4019_s3, 4  ;;  %s72_s25 = int_to_ptr.vmem [resolvable:$true] %s71_s25  ;;  %s56_s4 = int_to_ptr.hbm [resolvable:$true] %s55_s4 }
   0xd   :  { %74 = dma.hbm_to_vmem [thread:$0]  %s70_s22, 128, %s72_s25, [#allocation10]  }
   0xe   :  { %s3813_s30 = smov [#allocation3]   ;;  %s3814_s12 = smov [#allocation8]  }
   0xf   :  { %s29_s11 = sshll.u32 %s3813_s30, 4  ;;  %s57_s13 = sshll.u32 %s3814_s12, 4  ;;  %s30_s11 = int_to_ptr.vmem [resolvable:$true] %s29_s11  ;;  %s58_s13 = int_to_ptr.vmem [resolvable:$true] %s57_s13 }
  0x10   :  { %35 = dma.hbm_to_vmem [thread:$0]  %s28_s1, 512, %s30_s11, [#allocation4], %s3810_s23, %s3810_s23, %s3811_s8  }
  0x11   :  { %s3815_s14 = smov 512   ;;  %s3816_s0 = smov 32  }
  0x12   :  { %63 = dma.hbm_to_vmem [thread:$0]  %s56_s4, 16384, %s58_s13, [#allocation7], %s3815_s14, %s3815_s14, %s3816_s0  }
  0x13   :  { %s79_s17 = sshll.u32 %s4021_s5, 4  ;;  %s3817_s3 = smov [#allocation11]   ;;  %s80_s17 = int_to_ptr.hbm [resolvable:$true] %s79_s17 }
  0x14   :  { %s81_s18 = sshll.u32 %s3817_s3, 4  ;;  %s3818_s19 = smov 64   ;;  %s82_s18 = int_to_ptr.vmem [resolvable:$true] %s81_s18 }
  0x15   :  { %s3819_s20 = smov 4  }
  0x16   :  { %87 = dma.hbm_to_vmem [thread:$0]  %s80_s17, 8192, %s82_s18, [#allocation10], %s3818_s19, %s3818_s19, %s3819_s20  }
  0x17   :  { %3799 = dma.done.wait [#allocation4], 512  }
  0x18   :  { %3800 = vsyncadd [#allocation4], 4294966784 }
  0x19   :  { %3801 = dma.done.wait [#allocation7], 20480  }
  0x1a   :  { %3802 = vsyncadd [#allocation7], 4294946816 }
  0x1b   :  { %3803 = dma.done.wait [#allocation10], 8320  }
  0x1c   :  { %3804 = vsyncadd [#allocation10], 4294958976  ;;  %v2523_v1 = vld [vmem:[#allocation6 + $0x70] sm:$0xf]  ;;  %v3384_v2 = vld [vmem:[#allocation6 + $0x74] sm:$0xf0] }
  0x1d   :  { %v2587_v3 = vld [vmem:[#allocation6 + $0xf0] sm:$0xf]  ;;  %v2524_v4 = vor.u32 %v3384_v2, %v2523_v1  ;;  %v3400_v5 = vld [vmem:[#allocation6 + $0xf4] sm:$0xf0]  ;;  %v3383_v6 = vld [vmem:[#allocation6 + $0x74] sm:$0xf] }
  0x1e   :  { %v2525_v7 = vld [vmem:[#allocation6 + $0x78] sm:$0xf0]  ;;  %v2588_v8 = vor.u32 %v3400_v5, %v2587_v3  ;;  %v3399_v10 = vld [vmem:[#allocation6 + $0xf4] sm:$0xf]  ;;  %v2515_v12 = vld [vmem:[#allocation6 + $0x60] sm:$0xf] }
  0x1f   :  { %v2528_v9 = vor.u32 %v3383_v6, %v2525_v7  ;;  %v2589_v11 = vld [vmem:[#allocation6 + $0xf8] sm:$0xf0]  ;;  %336 = vmatpush.bf16.msra.mxu0 %v2524_v4  ;;  %v3382_v14 = vld [vmem:[#allocation6 + $0x64] sm:$0xf0]  ;;  %v2579_v15 = vld [vmem:[#allocation6 + $0xe0] sm:$0xf] }
  0x20   :  { %v2592_v13 = vor.u32 %v3399_v10, %v2589_v11  ;;  %v3398_v16 = vld [vmem:[#allocation6 + $0xe4] sm:$0xf0]  ;;  %355 = vmatpush.bf16.msra.mxu1 %v2588_v8  ;;  %v2516_v17 = vor.u32 %v3382_v14, %v2515_v12  ;;  %v3381_v19 = vld [vmem:[#allocation6 + $0x64] sm:$0xf]  ;;  %v2517_v20 = vld [vmem:[#allocation6 + $0x68] sm:$0xf0] }
  0x21   :  { %374 = vmatpush.bf16.msra.mxu2 %v2528_v9  ;;  %v2580_v18 = vor.u32 %v3398_v16, %v2579_v15  ;;  %v3397_v21 = vld [vmem:[#allocation6 + $0xe4] sm:$0xf]  ;;  %v2520_v22 = vor.u32 %v3381_v19, %v2517_v20  ;;  %v2581_v23 = vld [vmem:[#allocation6 + $0xe8] sm:$0xf0]  ;;  %v2507_v24 = vld [vmem:[#allocation6 + $0x50] sm:$0xf] }
  0x22   :  { %393 = vmatpush.bf16.msra.mxu3 %v2592_v13  ;;  %v3380_v25 = vld [vmem:[#allocation6 + $0x54] sm:$0xf0]  ;;  %v2584_v26 = vor.u32 %v3397_v21, %v2581_v23  ;;  %v2571_v27 = vld [vmem:[#allocation6 + $0xd0] sm:$0xf]  ;;  %v3379_v29 = vld [vmem:[#allocation6 + $0x54] sm:$0xf] }
  0x23   :  { %v3396_v28 = vld [vmem:[#allocation6 + $0xd4] sm:$0xf0]  ;;  %337 = vmatpush.bf16.msra.mxu0 %v2516_v17  ;;  %v2508_v30 = vor.u32 %v3380_v25, %v2507_v24  ;;  %v2509_v31 = vld [vmem:[#allocation6 + $0x58] sm:$0xf0]  ;;  %v3395_v32 = vld [vmem:[#allocation6 + $0xd4] sm:$0xf] }
  0x24   :  { %v2573_v33 = vld [vmem:[#allocation6 + $0xd8] sm:$0xf0]  ;;  %356 = vmatpush.bf16.msra.mxu1 %v2580_v18  ;;  %v2572_v34 = vor.u32 %v3396_v28, %v2571_v27  ;;  %v2512_v35 = vor.u32 %v3379_v29, %v2509_v31  ;;  %v2499_v36 = vld [vmem:[#allocation6 + $0x40] sm:$0xf]  ;;  %v3378_v37 = vld [vmem:[#allocation6 + $0x44] sm:$0xf0] }
  0x25   :  { %375 = vmatpush.bf16.msra.mxu2 %v2520_v22  ;;  %v2563_v38 = vld [vmem:[#allocation6 + $0xc0] sm:$0xf]  ;;  %v2576_v39 = vor.u32 %v3395_v32, %v2573_v33  ;;  %v3394_v40 = vld [vmem:[#allocation6 + $0xc4] sm:$0xf0]  ;;  %v3377_v41 = vld [vmem:[#allocation6 + $0x44] sm:$0xf]  ;;  %v2500_v45 = vor.u32 %v3378_v37, %v2499_v36 }
  0x26   :  { %394 = vmatpush.bf16.msra.mxu3 %v2584_v26  ;;  %v2501_v42 = vld [vmem:[#allocation6 + $0x48] sm:$0xf0]  ;;  %v3393_v43 = vld [vmem:[#allocation6 + $0xc4] sm:$0xf]  ;;  %v2564_v46 = vor.u32 %v3394_v40, %v2563_v38  ;;  %v2491_v48 = vld [vmem:[#allocation6 + $0x30] sm:$0xf] }
  0x27   :  { %v2565_v44 = vld [vmem:[#allocation6 + $0xc8] sm:$0xf0]  ;;  %338 = vmatpush.bf16.msra.mxu0 %v2508_v30  ;;  %v2504_v47 = vor.u32 %v3377_v41, %v2501_v42  ;;  %v3376_v49 = vld [vmem:[#allocation6 + $0x34] sm:$0xf0]  ;;  %v2555_v50 = vld [vmem:[#allocation6 + $0xb0] sm:$0xf] }
  0x28   :  { %357 = vmatpush.bf16.msra.mxu1 %v2572_v34  ;;  %v2568_v51 = vor.u32 %v3393_v43, %v2565_v44  ;;  %v3392_v52 = vld [vmem:[#allocation6 + $0xb4] sm:$0xf0]  ;;  %v3375_v53 = vld [vmem:[#allocation6 + $0x34] sm:$0xf]  ;;  %v2493_v54 = vld [vmem:[#allocation6 + $0x38] sm:$0xf0]  ;;  %v2492_v57 = vor.u32 %v3376_v49, %v2491_v48 }
  0x29   :  { %376 = vmatpush.bf16.msra.mxu2 %v2512_v35  ;;  %v3391_v55 = vld [vmem:[#allocation6 + $0xb4] sm:$0xf]  ;;  %v2557_v56 = vld [vmem:[#allocation6 + $0xb8] sm:$0xf0]  ;;  %v2556_v58 = vor.u32 %v3392_v52, %v2555_v50  ;;  %v2496_v59 = vor.u32 %v3375_v53, %v2493_v54  ;;  %v2483_v60 = vld [vmem:[#allocation6 + $0x20] sm:$0xf] }
  0x2a   :  { %395 = vmatpush.bf16.msra.mxu3 %v2576_v39  ;;  %v3374_v61 = vld [vmem:[#allocation6 + $0x24] sm:$0xf0]  ;;  %v2547_v62 = vld [vmem:[#allocation6 + $0xa0] sm:$0xf]  ;;  %v2560_v63 = vor.u32 %v3391_v55, %v2557_v56  ;;  %v3373_v1 = vld [vmem:[#allocation6 + $0x24] sm:$0xf] }
  0x2b   :  { %339 = vmatpush.bf16.msra.mxu0 %v2500_v45  ;;  %v3390_v0 = vld [vmem:[#allocation6 + $0xa4] sm:$0xf0]  ;;  %v2485_v2 = vld [vmem:[#allocation6 + $0x28] sm:$0xf0]  ;;  %v3389_v3 = vld [vmem:[#allocation6 + $0xa4] sm:$0xf]  ;;  %v2484_v5 = vor.u32 %v3374_v61, %v2483_v60 }
  0x2c   :  { %358 = vmatpush.bf16.msra.mxu1 %v2564_v46  ;;  %v2549_v4 = vld [vmem:[#allocation6 + $0xa8] sm:$0xf0]  ;;  %v2548_v6 = vor.u32 %v3390_v0, %v2547_v62  ;;  %v2488_v7 = vor.u32 %v3373_v1, %v2485_v2  ;;  %v2475_v8 = vld [vmem:[#allocation6 + $0x10] sm:$0xf]  ;;  %v3372_v9 = vld [vmem:[#allocation6 + $0x14] sm:$0xf0] }
  0x2d   :  { %377 = vmatpush.bf16.msra.mxu2 %v2504_v47  ;;  %v2539_v10 = vld [vmem:[#allocation6 + $0x90] sm:$0xf]  ;;  %v2552_v11 = vor.u32 %v3389_v3, %v2549_v4  ;;  %v3388_v12 = vld [vmem:[#allocation6 + $0x94] sm:$0xf0]  ;;  %v3371_v13 = vld [vmem:[#allocation6 + $0x14] sm:$0xf]  ;;  %v2476_v17 = vor.u32 %v3372_v9, %v2475_v8 }
  0x2e   :  { %396 = vmatpush.bf16.msra.mxu3 %v2568_v51  ;;  %v2477_v14 = vld [vmem:[#allocation6 + $0x18] sm:$0xf0]  ;;  %v3387_v15 = vld [vmem:[#allocation6 + $0x94] sm:$0xf]  ;;  %v2467_v18 = vld [vmem:[#allocation6] sm:$0xf]  ;;  %v2540_v20 = vor.u32 %v3388_v12, %v2539_v10 }
  0x2f   :  { %340 = vmatpush.bf16.msra.mxu0 %v2492_v57  ;;  %v2541_v16 = vld [vmem:[#allocation6 + $0x98] sm:$0xf0]  ;;  %v3370_v19 = vld [vmem:[#allocation6 + $0x4] sm:$0xf0]  ;;  %v2480_v21 = vor.u32 %v3371_v13, %v2477_v14  ;;  %v2531_v22 = vld [vmem:[#allocation6 + $0x80] sm:$0xf] }
  0x30   :  { %359 = vmatpush.bf16.msra.mxu1 %v2556_v58  ;;  %v3386_v23 = vld [vmem:[#allocation6 + $0x84] sm:$0xf0]  ;;  %v3369_v24 = vld [vmem:[#allocation6 + $0x4] sm:$0xf]  ;;  %v2544_v25 = vor.u32 %v3387_v15, %v2541_v16  ;;  %v2469_v26 = vld [vmem:[#allocation6 + $0x8] sm:$0xf0]  ;;  %v2468_v32 = vor.u32 %v3370_v19, %v2467_v18 }
  0x31   :  { %378 = vmatpush.bf16.msra.mxu2 %v2496_v59  ;;  %v3385_v27 = vld [vmem:[#allocation6 + $0x84] sm:$0xf]  ;;  %v2533_v28 = vld [vmem:[#allocation6 + $0x88] sm:$0xf0]  ;;  %v2451_v29 = vld [vmem:[#allocation3] sm:$0xf]  ;;  %v2532_v36 = vor.u32 %v3386_v23, %v2531_v22  ;;  %v2472_v37 = vor.u32 %v3369_v24, %v2469_v26 }
  0x32   :  { %397 = vmatpush.bf16.msra.mxu3 %v2560_v63  ;;  %v2819_v30 = vld [vmem:[#allocation8 + $0x1c0] sm:$0xf]  ;;  %v3366_v33 = vld [vmem:[#allocation3 + $0x4] sm:$0xf0]  ;;  %v3457_v34 = vld [vmem:[#allocation8 + $0x1c4] sm:$0xf]  ;;  %v2536_v41 = vor.u32 %v3385_v27, %v2533_v28 }
  0x33   :  { %341 = vmatpush.bf16.msra.mxu0 %v2484_v5  ;;  %v3461_v31 = vld [vmem:[#allocation8 + $0x1dc] sm:$0xf0]  ;;  %v2821_v35 = vld [vmem:[#allocation8 + $0x1e0] sm:$0xf0]  ;;  %v2453_v39 = vld [vmem:[#allocation3 + $0x8] sm:$0xf0]  ;;  %v2452_v46 = vor.u32 %v3366_v33, %v2451_v29 }
  0x34   :  { %360 = vmatpush.bf16.msra.mxu1 %v2548_v6  ;;  %v3365_v38 = vld [vmem:[#allocation3 + $0x4] sm:$0xf]  ;;  %v2787_v40 = vld [vmem:[#allocation8 + $0x180] sm:$0xf]  ;;  %v2820_v42 = vor.u32 %v3461_v31, %v2819_v30  ;;  %v2824_v47 = vor.u32 %v3457_v34, %v2821_v35  ;;  %v2459_v5 = vld [vmem:[#allocation3 + $0x10] sm:$0xf] }
  0x35   :  { %379 = vmatpush.bf16.msra.mxu2 %v2488_v7  ;;  %v3453_v43 = vld [vmem:[#allocation8 + $0x19c] sm:$0xf0]  ;;  %v3449_v48 = vld [vmem:[#allocation8 + $0x184] sm:$0xf]  ;;  %v2456_v51 = vor.u32 %v3365_v38, %v2453_v39  ;;  %v3368_v6 = vld [vmem:[#allocation3 + $0x14] sm:$0xf0] }
  0x36   :  { %398 = vmatpush.bf16.msra.mxu3 %v2552_v11  ;;  %v3075_v44 = vld [vmem:[#allocation8 + $0x3c0] sm:$0xf]  ;;  %v3521_v49 = vld [vmem:[#allocation8 + $0x3c4] sm:$0xf]  ;;  %v2788_v54 = vor.u32 %v3453_v43, %v2787_v40  ;;  %v3367_v7 = vld [vmem:[#allocation3 + $0x14] sm:$0xf]  ;;  %v2460_v9 = vor.u32 %v3368_v6, %v2459_v5 }
  0x37   :  { %342 = vmatpush.bf16.msra.mxu0 %v2476_v17  ;;  %v3525_v45 = vld [vmem:[#allocation8 + $0x3dc] sm:$0xf0]  ;;  %v3077_v50 = vld [vmem:[#allocation8 + $0x3e0] sm:$0xf0]  ;;  %v2461_v8 = vld [vmem:[#allocation3 + $0x18] sm:$0xf0] }
  0x38   :  { %361 = vmatpush.bf16.msra.mxu1 %v2540_v20  ;;  %v2789_v52 = vld [vmem:[#allocation8 + $0x1a0] sm:$0xf0]  ;;  %v3076_v53 = vor.u32 %v3525_v45, %v3075_v44  ;;  %v3080_v55 = vor.u32 %v3521_v49, %v3077_v50  ;;  %v2755_v56 = vld [vmem:[#allocation8 + $0x140] sm:$0xf]  ;;  %v2464_v10 = vor.u32 %v3367_v7, %v2461_v8  ;;  %v2827_v7 = vld [vmem:[#allocation8 + $0x1c8] sm:$0xf] }
  0x39   :  { %380 = vmatpush.bf16.msra.mxu2 %v2480_v21  ;;  %v3043_v57 = vld [vmem:[#allocation8 + $0x380] sm:$0xf]  ;;  %v2792_v59 = vor.u32 %v3449_v48, %v2789_v52  ;;  %v3513_v61 = vld [vmem:[#allocation8 + $0x384] sm:$0xf]  ;;  %v3462_v8 = vld [vmem:[#allocation8 + $0x1e4] sm:$0xf0] }
  0x3a   :  { %399 = vmatpush.bf16.msra.mxu3 %v2544_v25  ;;  %v3517_v58 = vld [vmem:[#allocation8 + $0x39c] sm:$0xf0]  ;;  %v3045_v62 = vld [vmem:[#allocation8 + $0x3a0] sm:$0xf0]  ;;  %s2416_s1 = sshll.u32 %s4025_s9, 4  ;;  %s3822_s28 = smov 256   ;;  %s2417_s1 = int_to_ptr.hbm [resolvable:$true] %s2416_s1 }
  0x3b   :  { %343 = vmatpush.bf16.msra.mxu0 %v2468_v32  ;;  %v3445_v60 = vld [vmem:[#allocation8 + $0x15c] sm:$0xf0]  ;;  %v3441_v63 = vld [vmem:[#allocation8 + $0x144] sm:$0xf]  ;;  %v3044_v1 = vor.u32 %v3517_v58, %v3043_v57  ;;  %v3048_v3 = vor.u32 %v3513_v61, %v3045_v62  ;;  %s3823_s29 = smov 16   ;;  %s3824_s9 = smov [#allocation13]  }
  0x3c   :  { %362 = vmatpush.bf16.msra.mxu1 %v2532_v36  ;;  %v2757_v0 = vld [vmem:[#allocation8 + $0x160] sm:$0xf0]  ;;  %v2756_v2 = vor.u32 %v3445_v60, %v2755_v56  ;;  %v2723_v11 = vld [vmem:[#allocation8 + $0x100] sm:$0xf]  ;;  %s2427_s4 = sshll.u32 %s3824_s9, 4  ;;  %s2429_s12 = sshll.u32 %s4026_s10, 4  ;;  %s2428_s4 = int_to_ptr.vmem [resolvable:$true] %s2427_s4  ;;  %s2430_s12 = int_to_ptr.hbm [resolvable:$true] %s2429_s12 }
  0x3d   :  { %381 = vmatpush.bf16.msra.mxu2 %v2472_v37  ;;  %v2760_v4 = vor.u32 %v3441_v63, %v2757_v0  ;;  %v3437_v12 = vld [vmem:[#allocation8 + $0x11c] sm:$0xf0]  ;;  %v3433_v13 = vld [vmem:[#allocation8 + $0x104] sm:$0xf] }
  0x3e   :  { %400 = vmatpush.bf16.msra.mxu3 %v2536_v41  ;;  %344 = vmatmul.bf16.vlgmr.msra.gmra.mxu0 %v2452_v46  ;;  %v2724_v14 = vor.u32 %v3437_v12, %v2723_v11  ;;  %v2725_v15 = vld [vmem:[#allocation8 + $0x120] sm:$0xf0]  ;;  %v3011_v19 = vld [vmem:[#allocation8 + $0x340] sm:$0xf]  ;;  %v2829_v11 = vld [vmem:[#allocation8 + $0x1e8] sm:$0xf0] }
  0x3f   :  { %1226 = vmatpush.bf16.msrb.mxu0 %v2820_v42  ;;  %363 = vmatmul.bf16.vlgmr.msra.gmra.mxu1 %v2456_v51  ;;  %v2728_v16 = vor.u32 %v3433_v13, %v2725_v15  ;;  %v3505_v17 = vld [vmem:[#allocation8 + $0x344] sm:$0xf]  ;;  %v3509_v21 = vld [vmem:[#allocation8 + $0x35c] sm:$0xf0] }
  0x40   :  { %382 = vmatmul.bf16.vlgmr.msra.gmra.mxu2 %v2452_v46  ;;  %1245 = vmatpush.bf16.msrb.mxu1 %v3076_v53  ;;  %v3013_v18 = vld [vmem:[#allocation8 + $0x360] sm:$0xf0]  ;;  %v3012_v22 = vor.u32 %v3509_v21, %v3011_v19  ;;  %v2691_v23 = vld [vmem:[#allocation8 + $0xc0] sm:$0xf]  ;;  %v2795_v19 = vld [vmem:[#allocation8 + $0x188] sm:$0xf] }
  0x41   :  { %1264 = vmatpush.bf16.msrb.mxu2 %v2824_v47  ;;  %401 = vmatmul.bf16.vlgmr.msra.gmra.mxu3 %v2456_v51  ;;  %v3016_v20 = vor.u32 %v3505_v17, %v3013_v18  ;;  %v3429_v24 = vld [vmem:[#allocation8 + $0xdc] sm:$0xf0]  ;;  %v3425_v25 = vld [vmem:[#allocation8 + $0xc4] sm:$0xf]  ;;  %v3450_v21 = vld [vmem:[#allocation8 + $0x18c] sm:$0xf] }
  0x42   :  { %1283 = vmatpush.bf16.msrb.mxu3 %v3080_v55  ;;  %v2692_v26 = vor.u32 %v3429_v24, %v2691_v23  ;;  %v2693_v27 = vld [vmem:[#allocation8 + $0xe0] sm:$0xf0]  ;;  %v2979_v31 = vld [vmem:[#allocation8 + $0x300] sm:$0xf]  ;;  %v2797_v24 = vld [vmem:[#allocation8 + $0x1a8] sm:$0xf0] }
  0x43   :  { %1227 = vmatpush.bf16.msrb.mxu0 %v2788_v54  ;;  %v2696_v28 = vor.u32 %v3425_v25, %v2693_v27  ;;  %v3497_v29 = vld [vmem:[#allocation8 + $0x304] sm:$0xf]  ;;  %v3501_v33 = vld [vmem:[#allocation8 + $0x31c] sm:$0xf0]  ;;  %v2800_v25 = vor.u32 %v3450_v21, %v2797_v24  ;;  %v3085_v27 = vld [vmem:[#allocation8 + $0x3e8] sm:$0xf0] }
  0x44   :  { %1246 = vmatpush.bf16.msrb.mxu1 %v3044_v1  ;;  %v2981_v30 = vld [vmem:[#allocation8 + $0x320] sm:$0xf0]  ;;  %v2980_v34 = vor.u32 %v3501_v33, %v2979_v31  ;;  %v2659_v35 = vld [vmem:[#allocation8 + $0x80] sm:$0xf]  ;;  %v3446_v33 = vld [vmem:[#allocation8 + $0x164] sm:$0xf0] }
  0x45   :  { %1265 = vmatpush.bf16.msrb.mxu2 %v2792_v59  ;;  %v2984_v32 = vor.u32 %v3497_v29, %v2981_v30  ;;  %v3421_v36 = vld [vmem:[#allocation8 + $0x9c] sm:$0xf0]  ;;  %v3417_v38 = vld [vmem:[#allocation8 + $0x84] sm:$0xf]  ;;  %v3526_v30 = vld [vmem:[#allocation8 + $0x3e4] sm:$0xf0] }
  0x46   :  { %1284 = vmatpush.bf16.msrb.mxu3 %v3048_v3  ;;  %v2660_v37 = vor.u32 %v3421_v36, %v2659_v35  ;;  %v2661_v39 = vld [vmem:[#allocation8 + $0xa0] sm:$0xf0]  ;;  %v2947_v43 = vld [vmem:[#allocation8 + $0x2c0] sm:$0xf]  ;;  %v3490_v24 = vld [vmem:[#allocation8 + $0x2cc] sm:$0xf] }
  0x47   :  { %1228 = vmatpush.bf16.msrb.mxu0 %v2756_v2  ;;  %v2664_v40 = vor.u32 %v3417_v38, %v2661_v39  ;;  %v3489_v41 = vld [vmem:[#allocation8 + $0x2c4] sm:$0xf]  ;;  %v3493_v45 = vld [vmem:[#allocation8 + $0x2dc] sm:$0xf0]  ;;  %v3514_v39 = vld [vmem:[#allocation8 + $0x38c] sm:$0xf] }
  0x48   :  { %1247 = vmatpush.bf16.msrb.mxu1 %v3012_v22  ;;  %v2949_v42 = vld [vmem:[#allocation8 + $0x2e0] sm:$0xf0]  ;;  %v2948_v46 = vor.u32 %v3493_v45, %v2947_v43  ;;  %v2627_v47 = vld [vmem:[#allocation8 + $0x40] sm:$0xf]  ;;  %v3518_v43 = vld [vmem:[#allocation8 + $0x3a4] sm:$0xf0] }
  0x49   :  { %1266 = vmatpush.bf16.msrb.mxu2 %v2760_v4  ;;  %v2952_v44 = vor.u32 %v3489_v41, %v2949_v42  ;;  %v3413_v48 = vld [vmem:[#allocation8 + $0x5c] sm:$0xf0]  ;;  %v3409_v49 = vld [vmem:[#allocation8 + $0x44] sm:$0xf]  ;;  %v3051_v41 = vld [vmem:[#allocation8 + $0x388] sm:$0xf] }
  0x4a   :  { %1285 = vmatpush.bf16.msrb.mxu3 %v3016_v20  ;;  %v2628_v50 = vor.u32 %v3413_v48, %v2627_v47  ;;  %v2629_v51 = vld [vmem:[#allocation8 + $0x60] sm:$0xf0]  ;;  %v2915_v55 = vld [vmem:[#allocation8 + $0x280] sm:$0xf]  ;;  %v3454_v20 = vld [vmem:[#allocation8 + $0x1a4] sm:$0xf0] }
  0x4b   :  { %1229 = vmatpush.bf16.msrb.mxu0 %v2724_v14  ;;  %v2632_v52 = vor.u32 %v3409_v49, %v2629_v51  ;;  %v3481_v53 = vld [vmem:[#allocation8 + $0x284] sm:$0xf]  ;;  %v3485_v57 = vld [vmem:[#allocation8 + $0x29c] sm:$0xf0]  ;;  %v2796_v23 = vor.u32 %v3454_v20, %v2795_v19  ;;  %v2731_v45 = vld [vmem:[#allocation8 + $0x108] sm:$0xf] }
  0x4c   :  { %1248 = vmatpush.bf16.msrb.mxu1 %v2980_v34  ;;  %v2917_v54 = vld [vmem:[#allocation8 + $0x2a0] sm:$0xf0]  ;;  %v2916_v58 = vor.u32 %v3485_v57, %v2915_v55  ;;  %v2595_v59 = vld [vmem:[#allocation8] sm:$0xf]  ;;  %v3442_v34 = vld [vmem:[#allocation8 + $0x14c] sm:$0xf] }
  0x4d   :  { %1267 = vmatpush.bf16.msrb.mxu2 %v2728_v16  ;;  %v2920_v56 = vor.u32 %v3481_v53, %v2917_v54  ;;  %v3405_v60 = vld [vmem:[#allocation8 + $0x1c] sm:$0xf0]  ;;  %v3401_v61 = vld [vmem:[#allocation8 + $0x4] sm:$0xf]  ;;  %v3434_v47 = vld [vmem:[#allocation8 + $0x10c] sm:$0xf] }
  0x4e   :  { %349 = vmatmul.bf16.gmra.mxu0 %v2460_v9  ;;  %1286 = vmatpush.bf16.msrb.mxu3 %v2984_v32  ;;  %v2596_v62 = vor.u32 %v3405_v60, %v2595_v59  ;;  %v2597_v63 = vld [vmem:[#allocation8 + $0x20] sm:$0xf0]  ;;  %v2883_v3 = vld [vmem:[#allocation8 + $0x240] sm:$0xf]  ;;  %v2763_v32 = vld [vmem:[#allocation8 + $0x148] sm:$0xf] }
  0x4f   :  { %368 = vmatmul.bf16.gmra.mxu1 %v2464_v10  ;;  %1230 = vmatpush.bf16.msrb.mxu0 %v2692_v26  ;;  %v2600_v0 = vor.u32 %v3401_v61, %v2597_v63  ;;  %v3473_v1 = vld [vmem:[#allocation8 + $0x244] sm:$0xf]  ;;  %v3477_v5 = vld [vmem:[#allocation8 + $0x25c] sm:$0xf0]  ;;  %v3522_v26 = vld [vmem:[#allocation8 + $0x3cc] sm:$0xf]  ;;  %v2764_v36 = vor.u32 %v3446_v33, %v2763_v32 }
  0x50   :  { %387 = vmatmul.bf16.gmra.mxu2 %v2460_v9  ;;  %1249 = vmatpush.bf16.msrb.mxu1 %v2948_v46  ;;  %v2885_v2 = vld [vmem:[#allocation8 + $0x260] sm:$0xf0]  ;;  %v2884_v6 = vor.u32 %v3477_v5, %v2883_v3  ;;  %v3458_v9 = vld [vmem:[#allocation8 + $0x1cc] sm:$0xf]  ;;  %v2851_v15 = vld [vmem:[#allocation8 + $0x200] sm:$0xf]  ;;  %v3088_v29 = vor.u32 %v3522_v26, %v3085_v27 }
  0x51   :  { %406 = vmatmul.bf16.gmra.mxu3 %v2464_v10  ;;  %1268 = vmatpush.bf16.msrb.mxu2 %v2696_v28  ;;  %v2888_v4 = vor.u32 %v3473_v1, %v2885_v2  ;;  %v2828_v10 = vor.u32 %v3462_v8, %v2827_v7  ;;  %v2832_v12 = vor.u32 %v3458_v9, %v2829_v11  ;;  %v3465_v13 = vld [vmem:[#allocation8 + $0x204] sm:$0xf]  ;;  %v3469_v17 = vld [vmem:[#allocation8 + $0x21c] sm:$0xf0]  ;;  %v3083_v28 = vld [vmem:[#allocation8 + $0x3c8] sm:$0xf] }
  0x52   :  { %1287 = vmatpush.bf16.msrb.mxu3 %v2952_v44  ;;  %v2853_v14 = vld [vmem:[#allocation8 + $0x220] sm:$0xf0]  ;;  %v2852_v18 = vor.u32 %v3469_v17, %v2851_v15  ;;  %v150_v22 = vld [vmem:[%s4018_s2] sm:$0x3]  ;;  %v3084_v31 = vor.u32 %v3526_v30, %v3083_v28  ;;  %v3052_v44 = vor.u32 %v3518_v43, %v3051_v41  ;;  %v3438_v46 = vld [vmem:[#allocation8 + $0x124] sm:$0xf0] }
  0x53   :  { %1231 = vmatpush.bf16.msrb.mxu0 %v2660_v37  ;;  %v2856_v16 = vor.u32 %v3465_v13, %v2853_v14  ;;  %v3907_v35 = vperm.slane %v150_v22, 0  ;;  %v2765_v37 = vld [vmem:[#allocation8 + $0x168] sm:$0xf0]  ;;  %v2732_v49 = vor.u32 %v3438_v46, %v2731_v45  ;;  %v2699_v61 = vld [vmem:[#allocation8 + $0xc8] sm:$0xf] }
  0x54   :  { %1250 = vmatpush.bf16.msrb.mxu1 %v2916_v58  ;;  %v2768_v38 = vor.u32 %v3442_v34, %v2765_v37  ;;  %v3506_v54 = vld [vmem:[#allocation8 + $0x34c] sm:$0xf]  ;;  %v3510_v58 = vld [vmem:[#allocation8 + $0x364] sm:$0xf0] }
  0x55   :  { %1269 = vmatpush.bf16.msrb.mxu2 %v2664_v40  ;;  %v3053_v40 = vld [vmem:[#allocation8 + $0x3a8] sm:$0xf0]  ;;  %v2987_v8 = vld [vmem:[#allocation8 + $0x308] sm:$0xf] }
  0x56   :  { %1288 = vmatpush.bf16.msrb.mxu3 %v2920_v56  ;;  %v3056_v42 = vor.u32 %v3514_v39, %v3053_v40  ;;  %v3021_v55 = vld [vmem:[#allocation8 + $0x368] sm:$0xf0]  ;;  %v3019_v56 = vld [vmem:[#allocation8 + $0x348] sm:$0xf] }
  0x57   :  { %1232 = vmatpush.bf16.msrb.mxu0 %v2628_v50  ;;  %v2733_v50 = vld [vmem:[#allocation8 + $0x128] sm:$0xf0]  ;;  %v3024_v57 = vor.u32 %v3506_v54, %v3021_v55  ;;  %v3020_v60 = vor.u32 %v3510_v58, %v3019_v56  ;;  %v3502_v9 = vld [vmem:[#allocation8 + $0x324] sm:$0xf0] }
  0x58   :  { %1251 = vmatpush.bf16.msrb.mxu1 %v2884_v6  ;;  %v2736_v53 = vor.u32 %v3434_v47, %v2733_v50  ;;  %v3426_v63 = vld [vmem:[#allocation8 + $0xcc] sm:$0xf]  ;;  %v2667_v13 = vld [vmem:[#allocation8 + $0x88] sm:$0xf] }
  0x59   :  { %1270 = vmatpush.bf16.msrb.mxu2 %v2632_v52  ;;  %v2701_v2 = vld [vmem:[#allocation8 + $0xe8] sm:$0xf0]  ;;  %v3422_v14 = vld [vmem:[#allocation8 + $0xa4] sm:$0xf0] }
  0x5a   :  { %1289 = vmatpush.bf16.msrb.mxu3 %v2888_v4  ;;  %v2704_v4 = vor.u32 %v3426_v63, %v2701_v2  ;;  %v3498_v5 = vld [vmem:[#allocation8 + $0x30c] sm:$0xf]  ;;  %v2668_v19 = vor.u32 %v3422_v14, %v2667_v13  ;;  %v2955_v28 = vld [vmem:[#allocation8 + $0x2c8] sm:$0xf] }
  0x5b   :  { %1233 = vmatpush.bf16.msrb.mxu0 %v2596_v62  ;;  %v3430_v62 = vld [vmem:[#allocation8 + $0xe4] sm:$0xf0]  ;;  %v2989_v6 = vld [vmem:[#allocation8 + $0x328] sm:$0xf0] }
  0x5c   :  { %1252 = vmatpush.bf16.msrb.mxu1 %v2852_v18  ;;  %v2700_v1 = vor.u32 %v3430_v62, %v2699_v61  ;;  %v2992_v7 = vor.u32 %v3498_v5, %v2989_v6  ;;  %v3418_v15 = vld [vmem:[#allocation8 + $0x8c] sm:$0xf]  ;;  %v2635_v30 = vld [vmem:[#allocation8 + $0x48] sm:$0xf] }
  0x5d   :  { %1271 = vmatpush.bf16.msrb.mxu2 %v2600_v0  ;;  %v3910_v0 = vperm.slane %v150_v22, 1  ;;  %v2669_v20 = vld [vmem:[#allocation8 + $0xa8] sm:$0xf0]  ;;  %v3414_v33 = vld [vmem:[#allocation8 + $0x64] sm:$0xf0] }
  0x5e   :  { %1290 = vmatpush.bf16.msrb.mxu3 %v2856_v16  ;;  %v3410_v34 = vld [vmem:[#allocation8 + $0x4c] sm:$0xf]  ;;  %v3486_v45 = vld [vmem:[#allocation8 + $0x2a4] sm:$0xf0] }
  0x5f   :  { %1302 = vmatpush.bf16.msra.mxu0 %v2828_v10  ;;  %v3482_v40 = vld [vmem:[#allocation8 + $0x28c] sm:$0xf]  ;;  %v2891_v62 = vld [vmem:[#allocation8 + $0x248] sm:$0xf] }
  0x60   :  { %1321 = vmatpush.bf16.msra.mxu1 %v3084_v31  ;;  %v2925_v41 = vld [vmem:[#allocation8 + $0x2a8] sm:$0xf0]  ;;  %v3478_v63 = vld [vmem:[#allocation8 + $0x264] sm:$0xf0] }
  0x61   :  { %1340 = vmatpush.bf16.msra.mxu2 %v2832_v12  ;;  %v2988_v12 = vor.u32 %v3502_v9, %v2987_v8  ;;  %v2928_v43 = vor.u32 %v3482_v40, %v2925_v41  ;;  %v3402_v50 = vld [vmem:[#allocation8 + $0xc] sm:$0xf]  ;;  %v3463_v8 = vld [vmem:[#allocation8 + $0x1ec] sm:$0xf0]  ;;  %v3459_v9 = vld [vmem:[#allocation8 + $0x1d4] sm:$0xf] }
  0x62   :  { %1359 = vmatpush.bf16.msra.mxu3 %v3088_v29  ;;  %v3494_v29 = vld [vmem:[#allocation8 + $0x2e4] sm:$0xf0]  ;;  %v2605_v54 = vld [vmem:[#allocation8 + $0x28] sm:$0xf0]  ;;  %v3091_v41 = vld [vmem:[#allocation8 + $0x3d0] sm:$0xf] }
  0x63   :  { %1303 = vmatpush.bf16.msra.mxu0 %v2796_v23  ;;  %v2672_v23 = vor.u32 %v3418_v15, %v2669_v20  ;;  %v2956_v32 = vor.u32 %v3494_v29, %v2955_v28  ;;  %v3474_v55 = vld [vmem:[#allocation8 + $0x24c] sm:$0xf]  ;;  %v3470_v20 = vld [vmem:[#allocation8 + $0x224] sm:$0xf0]  ;;  %v2805_v28 = vld [vmem:[#allocation8 + $0x1b0] sm:$0xf0] }
  0x64   :  { %1322 = vmatpush.bf16.msra.mxu1 %v3052_v44  ;;  %v2923_v44 = vld [vmem:[#allocation8 + $0x288] sm:$0xf]  ;;  %v2893_v56 = vld [vmem:[#allocation8 + $0x268] sm:$0xf0] }
  0x65   :  { %1341 = vmatpush.bf16.msra.mxu2 %v2800_v25  ;;  %v2957_v25 = vld [vmem:[#allocation8 + $0x2e8] sm:$0xf0]  ;;  %v2924_v47 = vor.u32 %v3486_v45, %v2923_v44  ;;  %v2896_v61 = vor.u32 %v3474_v55, %v2893_v56  ;;  %v3059_v55 = vld [vmem:[#allocation8 + $0x390] sm:$0xf] }
  0x66   :  { %1360 = vmatpush.bf16.msra.mxu3 %v3056_v42  ;;  %v2960_v27 = vor.u32 %v3490_v24, %v2957_v25  ;;  %v3466_v13 = vld [vmem:[#allocation8 + $0x20c] sm:$0xf]  ;;  %v3519_v56 = vld [vmem:[#allocation8 + $0x3ac] sm:$0xf0] }
  0x67   :  { %1304 = vmatpush.bf16.msra.mxu0 %v2764_v36  ;;  %v2637_v36 = vld [vmem:[#allocation8 + $0x68] sm:$0xf0] }
  0x68   :  { %1323 = vmatpush.bf16.msra.mxu1 %v3020_v60  ;;  %v2640_v39 = vor.u32 %v3410_v34, %v2637_v36  ;;  %v2608_v60 = vor.u32 %v3402_v50, %v2605_v54  ;;  %v3523_v36 = vld [vmem:[#allocation8 + $0x3d4] sm:$0xf] }
  0x69   :  { %1342 = vmatpush.bf16.msra.mxu2 %v2768_v38  ;;  %v2636_v38 = vor.u32 %v3414_v33, %v2635_v30 }
  0x6a   :  { %1361 = vmatpush.bf16.msra.mxu3 %v3024_v57 }
  0x6b   :  { %1305 = vmatpush.bf16.msra.mxu0 %v2732_v49  ;;  %v3406_v49 = vld [vmem:[#allocation8 + $0x24] sm:$0xf0] }
  0x6c   :  { %1324 = vmatpush.bf16.msra.mxu1 %v2988_v12  ;;  %v2837_v12 = vld [vmem:[#allocation8 + $0x1f0] sm:$0xf0] }
  0x6d   :  { %1343 = vmatpush.bf16.msra.mxu2 %v2736_v53  ;;  %v2840_v15 = vor.u32 %v3459_v9, %v2837_v12  ;;  %v3511_v9 = vld [vmem:[#allocation8 + $0x36c] sm:$0xf0] }
  0x6e   :  { %1362 = vmatpush.bf16.msra.mxu3 %v2992_v7  ;;  %v2835_v7 = vld [vmem:[#allocation8 + $0x1d0] sm:$0xf] }
  0x6f   :  { %1306 = vmatpush.bf16.msra.mxu0 %v2700_v1 }
  0x70   :  { %1325 = vmatpush.bf16.msra.mxu1 %v2956_v32 }
  0x71   :  { %1344 = vmatpush.bf16.msra.mxu2 %v2704_v4  ;;  %v2892_v4 = vor.u32 %v3478_v63, %v2891_v62 }
  0x72   :  { %1363 = vmatpush.bf16.msra.mxu3 %v2960_v27  ;;  %v3451_v27 = vld [vmem:[#allocation8 + $0x194] sm:$0xf] }
  0x73   :  { %1307 = vmatpush.bf16.msra.mxu0 %v2668_v19  ;;  %v2808_v33 = vor.u32 %v3451_v27, %v2805_v28  ;;  %v2675_v28 = vld [vmem:[#allocation8 + $0x90] sm:$0xf] }
  0x74   :  { %1326 = vmatpush.bf16.msra.mxu1 %v2924_v47  ;;  %v3443_v47 = vld [vmem:[#allocation8 + $0x154] sm:$0xf] }
  0x75   :  { %1345 = vmatpush.bf16.msra.mxu2 %v2672_v23 }
  0x76   :  { %1364 = vmatpush.bf16.msra.mxu3 %v2928_v43  ;;  %v2771_v43 = vld [vmem:[#allocation8 + $0x150] sm:$0xf] }
  0x77   :  { %1308 = vmatpush.bf16.msra.mxu0 %v2636_v38 }
  0x78   :  { %1327 = vmatpush.bf16.msra.mxu1 %v2892_v4  ;;  %v3029_v4 = vld [vmem:[#allocation8 + $0x370] sm:$0xf0] }
  0x79   :  { %1346 = vmatpush.bf16.msra.mxu2 %v2640_v39 }
  0x7a   :  { %1365 = vmatpush.bf16.msra.mxu3 %v2896_v61  ;;  %v3435_v61 = vld [vmem:[#allocation8 + $0x114] sm:$0xf] }
  0x7d   :  { %1347 = vmatpush.bf16.msra.mxu2 %v2608_v60  ;;  %v3439_v60 = vld [vmem:[#allocation8 + $0x12c] sm:$0xf0] }
  0xbb   :  { %v345_v48 = vpop.f32.mrf.mxu0 }
  0xbc   :  { %v346_v51 = vadd.f32 %v345_v48, %v3907_v35  ;;  %v364_v52 = vpop.f32.mrf.mxu1  ;;  %v2603_v48 = vld [vmem:[#allocation8 + $0x8] sm:$0xf] }
  0xbd   :  { %v2604_v53 = vor.u32 %v3406_v49, %v2603_v48 }
  0xbe   :  { %v365_v59 = vadd.f32 %v364_v52, %v346_v51 }
  0xbf   :  { %1309 = vmatpush.bf16.msra.mxu0 %v2604_v53 }
  0xc0   :  { %v412_v3 = vmul.f32 0.2, %v365_v59 }
  0xc2   :  { %v3912_v10 = vmax.f32 %v365_v59, %v412_v3 }
  0xc3   :  { %v383_v11 = vpop.f32.mrf.mxu2  ;;  %v347_v18 = vpop.f32.mrf.mxu0 }
  0xc4   :  { %v384_v16 = vadd.f32 %v383_v11, %v3910_v0  ;;  %v402_v17 = vpop.f32.mrf.mxu3  ;;  %428 = vst [vmem:[#allocation12] sm:$0xff] %v3912_v10  ;;  %v348_v21 = vadd.f32 %v347_v18, %v3907_v35  ;;  %v366_v22 = vpop.f32.mrf.mxu1 }
  0xc6   :  { %v403_v26 = vadd.f32 %v402_v17, %v384_v16  ;;  %v367_v31 = vadd.f32 %v366_v22, %v348_v21  ;;  %v2861_v16 = vld [vmem:[#allocation8 + $0x228] sm:$0xf0]  ;;  %v2859_v17 = vld [vmem:[#allocation8 + $0x208] sm:$0xf]  ;;  %v2803_v21 = vld [vmem:[#allocation8 + $0x190] sm:$0xf] }
  0xc7   :  { %v2864_v19 = vor.u32 %v3466_v13, %v2861_v16  ;;  %v3455_v22 = vld [vmem:[#allocation8 + $0x1ac] sm:$0xf0]  ;;  %v2860_v25 = vor.u32 %v3470_v20, %v2859_v17  ;;  %v3427_v16 = vld [vmem:[#allocation8 + $0xd4] sm:$0xf] }
  0xc8   :  { %v413_v37 = vmul.f32 0.2, %v403_v26  ;;  %v414_v42 = vmul.f32 0.2, %v367_v31  ;;  %v3499_v20 = vld [vmem:[#allocation8 + $0x314] sm:$0xf] }
  0xc9   :  { %1366 = vmatpush.bf16.msra.mxu3 %v2864_v19  ;;  %1328 = vmatpush.bf16.msra.mxu1 %v2860_v25  ;;  %v2709_v19 = vld [vmem:[#allocation8 + $0xf0] sm:$0xf0] }
  0xca   :  { %v421_v46 = vmax.f32 %v403_v26, %v413_v37  ;;  %v422_v51 = vmax.f32 %v367_v31, %v414_v42  ;;  %v2804_v26 = vor.u32 %v3455_v22, %v2803_v21  ;;  %v3093_v37 = vld [vmem:[#allocation8 + $0x3f0] sm:$0xf0]  ;;  %v3527_v42 = vld [vmem:[#allocation8 + $0x3ec] sm:$0xf0]  ;;  %v2712_v21 = vor.u32 %v3427_v16, %v2709_v19  ;;  %v2813_v19 = vld [vmem:[#allocation8 + $0x1b8] sm:$0xf0] }
  0xcb   :  { %v385_v52 = vpop.f32.mrf.mxu2  ;;  %v350_v59 = vpop.f32.mrf.mxu0  ;;  %v3096_v40 = vor.u32 %v3523_v36, %v3093_v37  ;;  %v3092_v45 = vor.u32 %v3527_v42, %v3091_v41  ;;  %v2997_v22 = vld [vmem:[#allocation8 + $0x330] sm:$0xf0]  ;;  %v3495_v41 = vld [vmem:[#allocation8 + $0x2ec] sm:$0xf0] }
  0xcc   :  { %429 = vst [vmem:[#allocation12 + $0x8] sm:$0xff] %v421_v46  ;;  %v386_v57 = vadd.f32 %v385_v52, %v3910_v0  ;;  %v404_v58 = vpop.f32.mrf.mxu3  ;;  %v3919_v1 = vpack.c.bf16 %v422_v51, %v3912_v10  ;;  %v351_v2 = vadd.f32 %v350_v59, %v3907_v35  ;;  %v369_v3 = vpop.f32.mrf.mxu1  ;;  %v2836_v10 = vor.u32 %v3463_v8, %v2835_v7  ;;  %v3061_v52 = vld [vmem:[#allocation8 + $0x3b0] sm:$0xf0]  ;;  %v2739_v59 = vld [vmem:[#allocation8 + $0x110] sm:$0xf] }
  0xcd   :  { %430 = vst [vmem:[#allocation12 + $0x10] sm:$0xff] %v422_v51  ;;  %v3515_v51 = vld [vmem:[#allocation8 + $0x394] sm:$0xf]  ;;  %v3027_v8 = vld [vmem:[#allocation8 + $0x350] sm:$0xf] }
  0xce   :  { %v405_v5 = vadd.f32 %v404_v58, %v386_v57  ;;  %v370_v6 = vadd.f32 %v369_v3, %v351_v2  ;;  %1234 = vmatmul.bf16.vlgmr.msrb.gmra.mxu0 %v3919_v1  ;;  %1272 = vmatmul.bf16.vlgmr.msrb.gmra.mxu2 %v3919_v1  ;;  %v3064_v54 = vor.u32 %v3515_v51, %v3061_v52  ;;  %v2741_v2 = vld [vmem:[#allocation8 + $0x130] sm:$0xf0]  ;;  %v2643_v42 = vld [vmem:[#allocation8 + $0x50] sm:$0xf] }
  0xcf   :  { %1378 = vmatpush.bf16.msrb.mxu0 %v2836_v10  ;;  %1416 = vmatpush.bf16.msrb.mxu2 %v2840_v15  ;;  %v3060_v58 = vor.u32 %v3519_v56, %v3059_v55  ;;  %v3507_v3 = vld [vmem:[#allocation8 + $0x354] sm:$0xf]  ;;  %v2744_v7 = vor.u32 %v3435_v61, %v2741_v2  ;;  %v3028_v13 = vor.u32 %v3511_v9, %v3027_v8  ;;  %v2707_v15 = vld [vmem:[#allocation8 + $0xd0] sm:$0xf]  ;;  %v2845_v8 = vld [vmem:[#allocation8 + $0x1f8] sm:$0xf0] }
  0xd0   :  { %v415_v11 = vmul.f32 0.2, %v405_v5  ;;  %v416_v14 = vmul.f32 0.2, %v370_v6  ;;  %v3032_v12 = vor.u32 %v3507_v3, %v3029_v4  ;;  %v3491_v37 = vld [vmem:[#allocation8 + $0x2d4] sm:$0xf] }
  0xd1   :  { %v3487_v51 = vld [vmem:[#allocation8 + $0x2ac] sm:$0xf0]  ;;  %v3403_v56 = vld [vmem:[#allocation8 + $0x14] sm:$0xf]  ;;  %v2843_v4 = vld [vmem:[#allocation8 + $0x1d8] sm:$0xf] }
  0xd2   :  { %v423_v18 = vmax.f32 %v405_v5, %v415_v11  ;;  %v3924_v23 = vmax.f32 %v370_v6, %v416_v14  ;;  %v2740_v6 = vor.u32 %v3439_v60, %v2739_v59  ;;  %v3407_v55 = vld [vmem:[#allocation8 + $0x2c] sm:$0xf0]  ;;  %v2901_v59 = vld [vmem:[#allocation8 + $0x270] sm:$0xf0] }
  0xd3   :  { %v388_v24 = vpop.f32.mrf.mxu2  ;;  %v352_v32 = vpop.f32.mrf.mxu0  ;;  %1379 = vmatpush.bf16.msrb.mxu0 %v2804_v26  ;;  %1417 = vmatpush.bf16.msrb.mxu2 %v2808_v33  ;;  %v3000_v26 = vor.u32 %v3499_v20, %v2997_v22  ;;  %v2899_v60 = vld [vmem:[#allocation8 + $0x250] sm:$0xf]  ;;  %v3467_v9 = vld [vmem:[#allocation8 + $0x214] sm:$0xf]  ;;  %v3524_v22 = vld [vmem:[#allocation8 + $0x3dc] sm:$0xf] }
  0xd4   :  { %431 = vst [vmem:[#allocation12 + $0x18] sm:$0xff] %v423_v18  ;;  %v3926_v29 = vpack.c.bf16 %v423_v18, %v421_v46  ;;  %v389_v30 = vadd.f32 %v388_v24, %v3910_v0  ;;  %v407_v31 = vpop.f32.mrf.mxu3  ;;  %v353_v34 = vadd.f32 %v352_v32, %v3907_v35  ;;  %v371_v39 = vpop.f32.mrf.mxu1  ;;  %v3447_v46 = vld [vmem:[#allocation8 + $0x16c] sm:$0xf0]  ;;  %v2773_v35 = vld [vmem:[#allocation8 + $0x170] sm:$0xf0] }
  0xd5   :  { %432 = vst [vmem:[#allocation12 + $0x20] sm:$0xff] %v3924_v23  ;;  %v2772_v49 = vor.u32 %v3447_v46, %v2771_v43  ;;  %v2776_v50 = vor.u32 %v3443_v47, %v2773_v35  ;;  %v3503_v24 = vld [vmem:[#allocation8 + $0x32c] sm:$0xf0]  ;;  %v2677_v32 = vld [vmem:[#allocation8 + $0xb0] sm:$0xf0] }
  0xd6   :  { %v408_v38 = vadd.f32 %v407_v31, %v389_v30  ;;  %1253 = vmatmul.bf16.vlgmr.msrb.gmra.mxu1 %v3926_v29  ;;  %1291 = vmatmul.bf16.vlgmr.msrb.gmra.mxu3 %v3926_v29  ;;  %v372_v44 = vadd.f32 %v371_v39, %v353_v34  ;;  %v3423_v30 = vld [vmem:[#allocation8 + $0xac] sm:$0xf0]  ;;  %v3419_v31 = vld [vmem:[#allocation8 + $0x94] sm:$0xf] }
  0xd7   :  { %1435 = vmatpush.bf16.msrb.mxu3 %v3096_v40  ;;  %1397 = vmatpush.bf16.msrb.mxu1 %v3092_v45  ;;  %v2676_v34 = vor.u32 %v3423_v30, %v2675_v28  ;;  %v2680_v36 = vor.u32 %v3419_v31, %v2677_v32  ;;  %v2963_v39 = vld [vmem:[#allocation8 + $0x2d0] sm:$0xf]  ;;  %v3411_v45 = vld [vmem:[#allocation8 + $0x54] sm:$0xf]  ;;  %v3448_v28 = vld [vmem:[#allocation8 + $0x174] sm:$0xf0] }
  0xd8   :  { %v417_v48 = vmul.f32 0.2, %v408_v38  ;;  %v418_v53 = vmul.f32 0.2, %v372_v44  ;;  %1380 = vmatpush.bf16.msrb.mxu0 %v2772_v49  ;;  %1418 = vmatpush.bf16.msrb.mxu2 %v2776_v50  ;;  %v3415_v43 = vld [vmem:[#allocation8 + $0x6c] sm:$0xf0] }
  0xd9   :  { %v2645_v46 = vld [vmem:[#allocation8 + $0x70] sm:$0xf0]  ;;  %v2644_v35 = vor.u32 %v3415_v43, %v2643_v42  ;;  %v2931_v50 = vld [vmem:[#allocation8 + $0x290] sm:$0xf]  ;;  %v3444_v32 = vld [vmem:[#allocation8 + $0x15c] sm:$0xf] }
  0xda   :  { %v425_v57 = vmax.f32 %v408_v38, %v417_v48  ;;  %v426_v62 = vmax.f32 %v372_v44, %v418_v53  ;;  %v2965_v38 = vld [vmem:[#allocation8 + $0x2f0] sm:$0xf0]  ;;  %v2964_v44 = vor.u32 %v3495_v41, %v2963_v39  ;;  %v2648_v48 = vor.u32 %v3411_v45, %v2645_v46  ;;  %v3479_v61 = vld [vmem:[#allocation8 + $0x26c] sm:$0xf0]  ;;  %v3067_v39 = vld [vmem:[#allocation8 + $0x398] sm:$0xf] }
  0xdb   :  { %v390_v63 = vpop.f32.mrf.mxu2  ;;  %1436 = vmatpush.bf16.msrb.mxu3 %v3064_v54  ;;  %1398 = vmatpush.bf16.msrb.mxu1 %v3060_v58  ;;  %v2968_v40 = vor.u32 %v3491_v37, %v2965_v38  ;;  %v3483_v47 = vld [vmem:[#allocation8 + $0x294] sm:$0xf]  ;;  %v2932_v53 = vor.u32 %v3487_v51, %v2931_v50  ;;  %v2611_v54 = vld [vmem:[#allocation8 + $0x10] sm:$0xf]  ;;  %v2900_v3 = vor.u32 %v3479_v61, %v2899_v60  ;;  %v3069_v38 = vld [vmem:[#allocation8 + $0x3b8] sm:$0xf0] }
  0xdc   :  { %433 = vst [vmem:[#allocation12 + $0x28] sm:$0xff] %v425_v57  ;;  %v391_v5 = vadd.f32 %v390_v63, %v3910_v0  ;;  %v3935_v11 = vpack.c.bf16 %v426_v62, %v3924_v23  ;;  %v409_v10 = vpop.f32.mrf.mxu3  ;;  %v3431_v0 = vld [vmem:[#allocation8 + $0xec] sm:$0xf0]  ;;  %1381 = vmatpush.bf16.msrb.mxu0 %v2740_v6  ;;  %1419 = vmatpush.bf16.msrb.mxu2 %v2744_v7  ;;  %v2933_v49 = vld [vmem:[#allocation8 + $0x2b0] sm:$0xf0] }
  0xdd   :  { %434 = vst [vmem:[#allocation12 + $0x30] sm:$0xff] %v426_v62  ;;  %v2708_v18 = vor.u32 %v3431_v0, %v2707_v15  ;;  %v2995_v23 = vld [vmem:[#allocation8 + $0x310] sm:$0xf]  ;;  %v2936_v52 = vor.u32 %v3483_v47, %v2933_v49  ;;  %v3475_v58 = vld [vmem:[#allocation8 + $0x254] sm:$0xf]  ;;  %v2612_v62 = vor.u32 %v3407_v55, %v2611_v54 }
  0xde   :  { %v410_v14 = vadd.f32 %v409_v10, %v391_v5  ;;  %1239 = vmatmul.bf16.gmra.mxu0 %v3935_v11  ;;  %1277 = vmatmul.bf16.gmra.mxu2 %v3935_v11  ;;  %v2996_v27 = vor.u32 %v3503_v24, %v2995_v23  ;;  %v2904_v2 = vor.u32 %v3475_v58, %v2901_v59  ;;  %v3464_v5 = vld [vmem:[#allocation8 + $0x1f4] sm:$0xf0]  ;;  %v3460_v6 = vld [vmem:[#allocation8 + $0x1dc] sm:$0xf]  ;;  %v2869_v10 = vld [vmem:[#allocation8 + $0x230] sm:$0xf0] }
  0xdf   :  { %1437 = vmatpush.bf16.msrb.mxu3 %v3032_v12  ;;  %1399 = vmatpush.bf16.msrb.mxu1 %v3028_v13  ;;  %v2844_v7 = vor.u32 %v3464_v5, %v2843_v4  ;;  %v2848_v12 = vor.u32 %v3460_v6, %v2845_v8  ;;  %v2872_v13 = vor.u32 %v3467_v9, %v2869_v10  ;;  %v3471_v15 = vld [vmem:[#allocation8 + $0x22c] sm:$0xf0]  ;;  %v2811_v0 = vld [vmem:[#allocation8 + $0x198] sm:$0xf]  ;;  %v3101_v23 = vld [vmem:[#allocation8 + $0x3f8] sm:$0xf0] }
  0xe0   :  { %v419_v17 = vmul.f32 0.2, %v410_v14  ;;  %1382 = vmatpush.bf16.msrb.mxu0 %v2708_v18  ;;  %1420 = vmatpush.bf16.msrb.mxu2 %v2712_v21  ;;  %v3452_v18 = vld [vmem:[#allocation8 + $0x19c] sm:$0xf]  ;;  %v3099_v24 = vld [vmem:[#allocation8 + $0x3d8] sm:$0xf] }
  0xe1   :  { %v2816_v21 = vor.u32 %v3452_v18, %v2813_v19  ;;  %v2747_v43 = vld [vmem:[#allocation8 + $0x118] sm:$0xf]  ;;  %v3436_v45 = vld [vmem:[#allocation8 + $0x11c] sm:$0xf] }
  0xe2   :  { %v427_v25 = vmax.f32 %v410_v14, %v419_v17  ;;  %v2867_v14 = vld [vmem:[#allocation8 + $0x210] sm:$0xf]  ;;  %v3456_v17 = vld [vmem:[#allocation8 + $0x1b4] sm:$0xf0]  ;;  %v2749_v46 = vld [vmem:[#allocation8 + $0x138] sm:$0xf0] }
  0xe3   :  { %1438 = vmatpush.bf16.msrb.mxu3 %v3000_v26  ;;  %1400 = vmatpush.bf16.msrb.mxu1 %v2996_v27  ;;  %v2868_v16 = vor.u32 %v3471_v15, %v2867_v14  ;;  %v2812_v20 = vor.u32 %v3456_v17, %v2811_v0  ;;  %v3528_v26 = vld [vmem:[#allocation8 + $0x3f4] sm:$0xf0]  ;;  %v3508_v47 = vld [vmem:[#allocation8 + $0x35c] sm:$0xf]  ;;  %v2752_v51 = vor.u32 %v3436_v45, %v2749_v46 }
  0xe4   :  { %435 = vst [vmem:[#allocation12 + $0x38] sm:$0xff] %v427_v25  ;;  %v3939_v33 = vpack.c.bf16 %v427_v25, %v425_v57  ;;  %1383 = vmatpush.bf16.msrb.mxu0 %v2676_v34  ;;  %1421 = vmatpush.bf16.msrb.mxu2 %v2680_v36  ;;  %v2613_v57 = vld [vmem:[#allocation8 + $0x30] sm:$0xf0]  ;;  %v3104_v25 = vor.u32 %v3524_v22, %v3101_v23  ;;  %v2779_v27 = vld [vmem:[#allocation8 + $0x158] sm:$0xf] }
  0xe5   :  { %v2616_v63 = vor.u32 %v3403_v56, %v2613_v57  ;;  %v3100_v30 = vor.u32 %v3528_v26, %v3099_v24  ;;  %v2780_v31 = vor.u32 %v3448_v28, %v2779_v27  ;;  %v2781_v34 = vld [vmem:[#allocation8 + $0x178] sm:$0xf0]  ;;  %v3512_v49 = vld [vmem:[#allocation8 + $0x374] sm:$0xf0] }
  0xe6   :  { %1258 = vmatmul.bf16.gmra.mxu1 %v3939_v33  ;;  %1296 = vmatmul.bf16.gmra.mxu3 %v3939_v33  ;;  %v3516_v36 = vld [vmem:[#allocation8 + $0x39c] sm:$0xf]  ;;  %v2784_v37 = vor.u32 %v3444_v32, %v2781_v34  ;;  %v2715_v54 = vld [vmem:[#allocation8 + $0xd8] sm:$0xf] }
  0xe7   :  { %1439 = vmatpush.bf16.msrb.mxu3 %v2968_v40  ;;  %1401 = vmatpush.bf16.msrb.mxu1 %v2964_v44  ;;  %v3520_v40 = vld [vmem:[#allocation8 + $0x3b4] sm:$0xf0]  ;;  %v3072_v41 = vor.u32 %v3516_v36, %v3069_v38  ;;  %v3428_v56 = vld [vmem:[#allocation8 + $0xdc] sm:$0xf] }
  0xe8   :  { %1384 = vmatpush.bf16.msrb.mxu0 %v2644_v35  ;;  %1422 = vmatpush.bf16.msrb.mxu2 %v2648_v48  ;;  %v3068_v42 = vor.u32 %v3520_v40, %v3067_v39  ;;  %v3440_v44 = vld [vmem:[#allocation8 + $0x134] sm:$0xf0]  ;;  %v3037_v35 = vld [vmem:[#allocation8 + $0x378] sm:$0xf0] }
  0xe9   :  { %v3035_v48 = vld [vmem:[#allocation8 + $0x358] sm:$0xf]  ;;  %v2748_v50 = vor.u32 %v3440_v44, %v2747_v43  ;;  %v2717_v58 = vld [vmem:[#allocation8 + $0xf8] sm:$0xf0] }
  0xea   :  { %v3432_v55 = vld [vmem:[#allocation8 + $0xf4] sm:$0xf0]  ;;  %v3500_v59 = vld [vmem:[#allocation8 + $0x31c] sm:$0xf]  ;;  %v2720_v61 = vor.u32 %v3428_v56, %v2717_v58  ;;  %v3541_v56 = vld [vmem:[#allocation11 + $0x60] sm:$0xff] }
  0xeb   :  { %1440 = vmatpush.bf16.msrb.mxu3 %v2936_v52  ;;  %1402 = vmatpush.bf16.msrb.mxu1 %v2932_v53  ;;  %v3040_v52 = vor.u32 %v3508_v47, %v3037_v35  ;;  %v3036_v53 = vor.u32 %v3512_v49, %v3035_v48  ;;  %v2716_v57 = vor.u32 %v3432_v55, %v2715_v54  ;;  %v3005_v60 = vld [vmem:[#allocation8 + $0x338] sm:$0xf0]  ;;  %v3424_v5 = vld [vmem:[#allocation8 + $0xb4] sm:$0xf0]  ;;  %v3536_v48 = vld [vmem:[#allocation11 + $0x38] sm:$0xff] }
  0xec   :  { %1385 = vmatpush.bf16.msrb.mxu0 %v2612_v62  ;;  %1423 = vmatpush.bf16.msrb.mxu2 %v2616_v63  ;;  %v3008_v62 = vor.u32 %v3500_v59, %v3005_v60  ;;  %v3003_v63 = vld [vmem:[#allocation8 + $0x318] sm:$0xf]  ;;  %v3420_v6 = vld [vmem:[#allocation8 + $0x9c] sm:$0xf]  ;;  %v3542_v54 = vld [vmem:[#allocation11 + $0x68] sm:$0xff] }
  0xed   :  { %v3492_v10 = vld [vmem:[#allocation8 + $0x2dc] sm:$0xf]  ;;  %v3496_v15 = vld [vmem:[#allocation8 + $0x2f4] sm:$0xf0]  ;;  %v3532_v55 = vld [vmem:[#allocation11 + $0x18] sm:$0xff] }
  0xee   :  { %1310 = vmatmul.bf16.vlgmr.msra.gmra.mxu0 %v3919_v1  ;;  %1348 = vmatmul.bf16.vlgmr.msra.gmra.mxu2 %v3919_v1  ;;  %v2651_v0 = vld [vmem:[#allocation8 + $0x58] sm:$0xf]  ;;  %v3412_v18 = vld [vmem:[#allocation8 + $0x5c] sm:$0xf]  ;;  %v3540_v58 = vld [vmem:[#allocation11 + $0x58] sm:$0xff] }
  0xef   :  { %1441 = vmatpush.bf16.msrb.mxu3 %v2904_v2  ;;  %1403 = vmatpush.bf16.msrb.mxu1 %v2900_v3  ;;  %v3504_v2 = vld [vmem:[#allocation8 + $0x334] sm:$0xf0]  ;;  %v2653_v19 = vld [vmem:[#allocation8 + $0x78] sm:$0xf0]  ;;  %v3530_v59 = vld [vmem:[#allocation11 + $0x8] sm:$0xff] }
  0xf0   :  { %1454 = vmatpush.bf16.msra.mxu0 %v2844_v7  ;;  %1492 = vmatpush.bf16.msra.mxu2 %v2848_v12  ;;  %v2683_v3 = vld [vmem:[#allocation8 + $0x98] sm:$0xf]  ;;  %v3004_v4 = vor.u32 %v3504_v2, %v3003_v63  ;;  %v2685_v7 = vld [vmem:[#allocation8 + $0xb8] sm:$0xf0]  ;;  %v2656_v22 = vor.u32 %v3412_v18, %v2653_v19  ;;  %v3560_v2 = vld [vmem:[#allocation11 + $0xf8] sm:$0xff] }
  0xf1   :  { %v2684_v8 = vor.u32 %v3424_v5, %v2683_v3  ;;  %v2688_v9 = vor.u32 %v3420_v6, %v2685_v7  ;;  %v2973_v12 = vld [vmem:[#allocation8 + $0x2f8] sm:$0xf0]  ;;  %v2939_v24 = vld [vmem:[#allocation8 + $0x298] sm:$0xf]  ;;  %v3967_v5 = vld [vmem:[#allocation9] sm:$0xff] }
  0xf2   :  { %v2976_v14 = vor.u32 %v3492_v10, %v2973_v12  ;;  %v2941_v23 = vld [vmem:[#allocation8 + $0x2b8] sm:$0xf0]  ;;  %v2619_v28 = vld [vmem:[#allocation8 + $0x18] sm:$0xf]  ;;  %v3549_v6 = vld [vmem:[#allocation11 + $0xa0] sm:$0xff]  ;;  %v570_v7 = vperm.slane %v3967_v5, 0 }
  0xf3   :  { %1442 = vmatpush.bf16.msrb.mxu3 %v2872_v13  ;;  %1404 = vmatpush.bf16.msrb.mxu1 %v2868_v16  ;;  %v2971_v13 = vld [vmem:[#allocation8 + $0x2d8] sm:$0xf]  ;;  %v2621_v32 = vld [vmem:[#allocation8 + $0x38] sm:$0xf0]  ;;  %v3548_v12 = vld [vmem:[#allocation11 + $0x98] sm:$0xff] }
  0xf4   :  { %1455 = vmatpush.bf16.msra.mxu0 %v2812_v20  ;;  %1493 = vmatpush.bf16.msra.mxu2 %v2816_v21  ;;  %v3416_v16 = vld [vmem:[#allocation8 + $0x74] sm:$0xf0]  ;;  %v2972_v17 = vor.u32 %v3496_v15, %v2971_v13  ;;  %v3484_v20 = vld [vmem:[#allocation8 + $0x29c] sm:$0xf] }
  0xf5   :  { %v2652_v21 = vor.u32 %v3416_v16, %v2651_v0  ;;  %v2944_v26 = vor.u32 %v3484_v20, %v2941_v23  ;;  %v3476_v34 = vld [vmem:[#allocation8 + $0x25c] sm:$0xf]  ;;  %v3480_v38 = vld [vmem:[#allocation8 + $0x274] sm:$0xf0]  ;;  %v3971_v0 = vperm.slane %v3967_v5, 1  ;;  %v3556_v20 = vld [vmem:[#allocation11 + $0xd8] sm:$0xff] }
  0xf6   :  { %1329 = vmatmul.bf16.vlgmr.msra.gmra.mxu1 %v3926_v29  ;;  %1367 = vmatmul.bf16.vlgmr.msra.gmra.mxu3 %v3926_v29  ;;  %v2909_v36 = vld [vmem:[#allocation8 + $0x278] sm:$0xf0]  ;;  %v2875_v45 = vld [vmem:[#allocation8 + $0x218] sm:$0xf] }
  0xf7   :  { %1511 = vmatpush.bf16.msra.mxu3 %v3104_v25  ;;  %1473 = vmatpush.bf16.msra.mxu1 %v3100_v30  ;;  %v3488_v25 = vld [vmem:[#allocation8 + $0x2b4] sm:$0xf0]  ;;  %v3468_v43 = vld [vmem:[#allocation8 + $0x21c] sm:$0xf] }
  0xf8   :  { %1456 = vmatpush.bf16.msra.mxu0 %v2780_v31  ;;  %1494 = vmatpush.bf16.msra.mxu2 %v2784_v37  ;;  %v2940_v27 = vor.u32 %v3488_v25, %v2939_v24  ;;  %v3408_v30 = vld [vmem:[#allocation8 + $0x34] sm:$0xf0]  ;;  %v3404_v31 = vld [vmem:[#allocation8 + $0x1c] sm:$0xf] }
  0xf9   :  { %v2907_v37 = vld [vmem:[#allocation8 + $0x258] sm:$0xf]  ;;  %v2620_v39 = vor.u32 %v3408_v30, %v2619_v28  ;;  %v2624_v40 = vor.u32 %v3404_v31, %v2621_v32  ;;  %v2877_v44 = vld [vmem:[#allocation8 + $0x238] sm:$0xf0] }
  0xfa   :  { %v3472_v46 = vld [vmem:[#allocation8 + $0x234] sm:$0xf0]  ;;  %v2880_v47 = vor.u32 %v3468_v43, %v2877_v44 }
  0xfb   :  { %1512 = vmatpush.bf16.msra.mxu3 %v3072_v41  ;;  %1474 = vmatpush.bf16.msra.mxu1 %v3068_v42  ;;  %v2912_v41 = vor.u32 %v3476_v34, %v2909_v36  ;;  %v2908_v42 = vor.u32 %v3480_v38, %v2907_v37  ;;  %v2876_v35 = vor.u32 %v3472_v46, %v2875_v45  ;;  %v3535_v49 = vld [vmem:[#allocation11 + $0x30] sm:$0xff]  ;;  %v3545_v36 = vld [vmem:[#allocation11 + $0x80] sm:$0xff]  ;;  %v3568_v46 = vld [vmem:[#allocation11 + $0x138] sm:$0xff] }
  0xfc   :  { %1457 = vmatpush.bf16.msra.mxu0 %v2748_v50  ;;  %1495 = vmatpush.bf16.msra.mxu2 %v2752_v51  ;;  %v3544_v50 = vld [vmem:[#allocation11 + $0x78] sm:$0xff]  ;;  %v3534_v51 = vld [vmem:[#allocation11 + $0x28] sm:$0xff]  ;;  %v3539_v60 = vld [vmem:[#allocation11 + $0x50] sm:$0xff] }
  0xfd   :  { %v3551_v63 = vld [vmem:[#allocation11 + $0xb0] sm:$0xff] }
  0xfe   :  { %1315 = vmatmul.bf16.gmra.mxu0 %v3935_v11  ;;  %1353 = vmatmul.bf16.gmra.mxu2 %v3935_v11  ;;  %v3547_v16 = vld [vmem:[#allocation11 + $0x90] sm:$0xff] }
  0xff   :  { %1513 = vmatpush.bf16.msra.mxu3 %v3040_v52  ;;  %1475 = vmatpush.bf16.msra.mxu1 %v3036_v53  ;;  %v3543_v52 = vld [vmem:[#allocation11 + $0x70] sm:$0xff]  ;;  %v3533_v53 = vld [vmem:[#allocation11 + $0x20] sm:$0xff] }
 0x100   :  { %1458 = vmatpush.bf16.msra.mxu0 %v2716_v57  ;;  %1496 = vmatpush.bf16.msra.mxu2 %v2720_v61  ;;  %v3531_v57 = vld [vmem:[#allocation11 + $0x10] sm:$0xff]  ;;  %v3538_v61 = vld [vmem:[#allocation11 + $0x48] sm:$0xff] }
 0x101   :  { %v3555_v30 = vld [vmem:[#allocation11 + $0xd0] sm:$0xff] }
 0x103   :  { %1514 = vmatpush.bf16.msra.mxu3 %v3008_v62  ;;  %1476 = vmatpush.bf16.msra.mxu1 %v3004_v4  ;;  %v3537_v62 = vld [vmem:[#allocation11 + $0x40] sm:$0xff]  ;;  %v3559_v4 = vld [vmem:[#allocation11 + $0xf0] sm:$0xff] }
 0x104   :  { %1459 = vmatpush.bf16.msra.mxu0 %v2684_v8  ;;  %1497 = vmatpush.bf16.msra.mxu2 %v2688_v9  ;;  %v3558_v9 = vld [vmem:[#allocation11 + $0xe8] sm:$0xff] }
 0x106   :  { %1334 = vmatmul.bf16.gmra.mxu1 %v3939_v33  ;;  %1372 = vmatmul.bf16.gmra.mxu3 %v3939_v33 }
 0x107   :  { %1515 = vmatpush.bf16.msra.mxu3 %v2976_v14  ;;  %1477 = vmatpush.bf16.msra.mxu1 %v2972_v17  ;;  %v3557_v14 = vld [vmem:[#allocation11 + $0xe0] sm:$0xff] }
 0x108   :  { %1460 = vmatpush.bf16.msra.mxu0 %v2652_v21  ;;  %1498 = vmatpush.bf16.msra.mxu2 %v2656_v22 }
 0x10b   :  { %1516 = vmatpush.bf16.msra.mxu3 %v2944_v26  ;;  %1478 = vmatpush.bf16.msra.mxu1 %v2940_v27  ;;  %v3546_v26 = vld [vmem:[#allocation11 + $0x88] sm:$0xff] }
 0x10c   :  { %1461 = vmatpush.bf16.msra.mxu0 %v2620_v39  ;;  %1499 = vmatpush.bf16.msra.mxu2 %v2624_v40 }
 0x10e   :  { %1386 = vmatmul.bf16.vlgmr.msrb.gmra.mxu0 %v3919_v1  ;;  %1424 = vmatmul.bf16.vlgmr.msrb.gmra.mxu2 %v3919_v1 }
 0x10f   :  { %1517 = vmatpush.bf16.msra.mxu3 %v2912_v41  ;;  %1479 = vmatpush.bf16.msra.mxu1 %v2908_v42  ;;  %v3554_v42 = vld [vmem:[#allocation11 + $0xc8] sm:$0xff] }
 0x110   :  { %2126 = vmatpush.bf16.msrb.mxu0 %v3536_v48 }
 0x113   :  { %1518 = vmatpush.bf16.msra.mxu3 %v2880_v47  ;;  %1480 = vmatpush.bf16.msra.mxu1 %v2876_v35 }
 0x114   :  { %2127 = vmatpush.bf16.msrb.mxu0 %v3535_v49  ;;  %v3553_v49 = vld [vmem:[#allocation11 + $0xc0] sm:$0xff] }
 0x116   :  { %1405 = vmatmul.bf16.vlgmr.msrb.gmra.mxu1 %v3926_v29  ;;  %1443 = vmatmul.bf16.vlgmr.msrb.gmra.mxu3 %v3926_v29 }
 0x117   :  { %2145 = vmatpush.bf16.msrb.mxu1 %v3544_v50  ;;  %2183 = vmatpush.bf16.msrb.mxu3 %v3560_v2 }
 0x118   :  { %2128 = vmatpush.bf16.msrb.mxu0 %v3534_v51 }
 0x11b   :  { %2146 = vmatpush.bf16.msrb.mxu1 %v3543_v52  ;;  %2184 = vmatpush.bf16.msrb.mxu3 %v3559_v4  ;;  %v3567_v52 = vld [vmem:[#allocation11 + $0x130] sm:$0xff]  ;;  %v3565_v4 = vld [vmem:[#allocation11 + $0x120] sm:$0xff] }
 0x11c   :  { %2129 = vmatpush.bf16.msrb.mxu0 %v3533_v53 }
 0x11e   :  { %1391 = vmatmul.bf16.gmra.mxu0 %v3935_v11  ;;  %1429 = vmatmul.bf16.gmra.mxu2 %v3935_v11 }
 0x11f   :  { %2147 = vmatpush.bf16.msrb.mxu1 %v3542_v54  ;;  %2185 = vmatpush.bf16.msrb.mxu3 %v3558_v9 }
 0x120   :  { %2130 = vmatpush.bf16.msrb.mxu0 %v3532_v55 }
 0x123   :  { %2148 = vmatpush.bf16.msrb.mxu1 %v3541_v56  ;;  %2186 = vmatpush.bf16.msrb.mxu3 %v3557_v14  ;;  %v3576_v56 = vld [vmem:[#allocation11 + $0x178] sm:$0xff] }
 0x124   :  { %2131 = vmatpush.bf16.msrb.mxu0 %v3531_v57 }
 0x126   :  { %1410 = vmatmul.bf16.gmra.mxu1 %v3939_v33  ;;  %1448 = vmatmul.bf16.gmra.mxu3 %v3939_v33 }
 0x127   :  { %2149 = vmatpush.bf16.msrb.mxu1 %v3540_v58  ;;  %2187 = vmatpush.bf16.msrb.mxu3 %v3556_v20 }
 0x128   :  { %2132 = vmatpush.bf16.msrb.mxu0 %v3530_v59 }
 0x12b   :  { %2150 = vmatpush.bf16.msrb.mxu1 %v3539_v60  ;;  %2188 = vmatpush.bf16.msrb.mxu3 %v3555_v30 }
 0x12e   :  { %1462 = vmatmul.bf16.vlgmr.msra.gmra.mxu0 %v3919_v1  ;;  %1500 = vmatmul.bf16.vlgmr.msra.gmra.mxu2 %v3919_v1  ;;  %v3529_v1 = vld [vmem:[#allocation11] sm:$0xff] }
 0x12f   :  { %2133 = vmatpush.bf16.msrb.mxu0 %v3529_v1  ;;  %2151 = vmatpush.bf16.msrb.mxu1 %v3538_v61  ;;  %v3566_v61 = vld [vmem:[#allocation11 + $0x128] sm:$0xff] }
 0x130   :  { %2189 = vmatpush.bf16.msrb.mxu3 %v3554_v42 }
 0x133   :  { %2152 = vmatpush.bf16.msrb.mxu1 %v3537_v62  ;;  %2202 = vmatpush.bf16.msra.mxu0 %v3568_v46 }
 0x134   :  { %2190 = vmatpush.bf16.msrb.mxu3 %v3553_v49 }
 0x136   :  { %1481 = vmatmul.bf16.vlgmr.msra.gmra.mxu1 %v3926_v29  ;;  %1519 = vmatmul.bf16.vlgmr.msra.gmra.mxu3 %v3926_v29  ;;  %v3552_v29 = vld [vmem:[#allocation11 + $0xb8] sm:$0xff] }
 0x137   :  { %2164 = vmatpush.bf16.msrb.mxu2 %v3552_v29  ;;  %2203 = vmatpush.bf16.msra.mxu0 %v3567_v52  ;;  %v3584_v52 = vld [vmem:[#allocation11 + $0x1b8] sm:$0xff] }
 0x138   :  { %2221 = vmatpush.bf16.msra.mxu1 %v3576_v56  ;;  %v3569_v56 = vld [vmem:[#allocation11 + $0x140] sm:$0xff] }
 0x13b   :  { %2165 = vmatpush.bf16.msrb.mxu2 %v3551_v63  ;;  %2204 = vmatpush.bf16.msra.mxu0 %v3566_v61  ;;  %v3575_v63 = vld [vmem:[#allocation11 + $0x170] sm:$0xff] }
 0x13c   :  { %2222 = vmatpush.bf16.msra.mxu1 %v3575_v63 }
 0x13e   :  { %1467 = vmatmul.bf16.gmra.mxu0 %v3935_v11  ;;  %1505 = vmatmul.bf16.gmra.mxu2 %v3935_v11  ;;  %v3550_v11 = vld [vmem:[#allocation11 + $0xa8] sm:$0xff] }
 0x13f   :  { %2166 = vmatpush.bf16.msrb.mxu2 %v3550_v11  ;;  %2205 = vmatpush.bf16.msra.mxu0 %v3565_v4  ;;  %v3582_v4 = vld [vmem:[#allocation11 + $0x1a8] sm:$0xff] }
 0x143   :  { %2167 = vmatpush.bf16.msrb.mxu2 %v3549_v6 }
 0x146   :  { %1486 = vmatmul.bf16.gmra.mxu1 %v3939_v33  ;;  %1524 = vmatmul.bf16.gmra.mxu3 %v3939_v33 }
 0x147   :  { %2168 = vmatpush.bf16.msrb.mxu2 %v3548_v12  ;;  %v3574_v12 = vld [vmem:[#allocation11 + $0x168] sm:$0xff] }
 0x148   :  { %2223 = vmatpush.bf16.msra.mxu1 %v3574_v12  ;;  %v3581_v12 = vld [vmem:[#allocation11 + $0x1a0] sm:$0xff] }
 0x14b   :  { %v1235_v3 = vpop.f32.mrf.mxu0  ;;  %2169 = vmatpush.bf16.msrb.mxu2 %v3547_v16  ;;  %v3564_v16 = vld [vmem:[#allocation11 + $0x118] sm:$0xff] }
 0x14c   :  { %v1236_v13 = vadd.f32 %v1235_v3, %v570_v7  ;;  %2206 = vmatpush.bf16.msra.mxu0 %v3564_v16 }
 0x14f   :  { %2170 = vmatpush.bf16.msrb.mxu2 %v3546_v26 }
 0x151   :  { %v1273_v8 = vpop.f32.mrf.mxu2 }
 0x152   :  { %v1274_v23 = vadd.f32 %v1273_v8, %v3971_v0  ;;  %v3978_v8 = vperm.slane %v3967_v5, 2 }
 0x153   :  { %v1254_v33 = vpop.f32.mrf.mxu1  ;;  %v1237_v10 = vpop.f32.mrf.mxu0  ;;  %2171 = vmatpush.bf16.msrb.mxu2 %v3545_v36  ;;  %v3562_v36 = vld [vmem:[#allocation11 + $0x108] sm:$0xff] }
 0x154   :  { %v1255_v15 = vadd.f32 %v1254_v33, %v1236_v13  ;;  %v1238_v18 = vadd.f32 %v1237_v10, %v570_v7 }
 0x156   :  { %v1530_v22 = vmul.f32 0.2, %v1255_v15 }
 0x157   :  { %2240 = vmatpush.bf16.msra.mxu2 %v3584_v52 }
 0x158   :  { %v1562_v31 = vmax.f32 %v1255_v15, %v1530_v22 }
 0x159   :  { %v1292_v17 = vpop.f32.mrf.mxu3  ;;  %v1275_v19 = vpop.f32.mrf.mxu2 }
 0x15a   :  { %v1293_v27 = vadd.f32 %v1292_v17, %v1274_v23  ;;  %v1276_v34 = vadd.f32 %v1275_v19, %v3971_v0  ;;  %v3573_v19 = vld [vmem:[#allocation11 + $0x160] sm:$0xff]  ;;  %v3563_v23 = vld [vmem:[#allocation11 + $0x110] sm:$0xff] }
 0x15b   :  { %v1256_v21 = vpop.f32.mrf.mxu1  ;;  %v1240_v25 = vpop.f32.mrf.mxu0  ;;  %2224 = vmatpush.bf16.msra.mxu1 %v3573_v19  ;;  %2207 = vmatpush.bf16.msra.mxu0 %v3563_v23  ;;  %v3580_v23 = vld [vmem:[#allocation11 + $0x198] sm:$0xff] }
 0x15c   :  { %v1257_v24 = vadd.f32 %v1256_v21, %v1238_v18  ;;  %v1531_v38 = vmul.f32 0.2, %v1293_v27  ;;  %v1241_v35 = vadd.f32 %v1240_v25, %v570_v7  ;;  %v3982_v21 = vperm.slane %v3967_v5, 3 }
 0x15e   :  { %v1538_v28 = vmul.f32 0.2, %v1257_v24  ;;  %v1563_v47 = vmax.f32 %v1293_v27, %v1531_v38  ;;  %v3572_v27 = vld [vmem:[#allocation11 + $0x158] sm:$0xff] }
 0x15f   :  { %2225 = vmatpush.bf16.msra.mxu1 %v3572_v27  ;;  %2208 = vmatpush.bf16.msra.mxu0 %v3562_v36 }
 0x160   :  { %v1570_v32 = vmax.f32 %v1257_v24, %v1538_v28 }
 0x161   :  { %v1294_v37 = vpop.f32.mrf.mxu3  ;;  %v1278_v41 = vpop.f32.mrf.mxu2 }
 0x162   :  { %v1594_v39 = vpack.c.bf16 %v1570_v32, %v1562_v31  ;;  %v1295_v40 = vadd.f32 %v1294_v37, %v1276_v34  ;;  %v1279_v59 = vadd.f32 %v1278_v41, %v3971_v0 }
 0x163   :  { %v1259_v43 = vpop.f32.mrf.mxu1  ;;  %v1242_v45 = vpop.f32.mrf.mxu0 }
 0x164   :  { %v1539_v44 = vmul.f32 0.2, %v1295_v40  ;;  %2134 = vmatmul.bf16.vlgmr.msrb.gmra.mxu0 %v1594_v39  ;;  %v1260_v51 = vadd.f32 %v1259_v43, %v1241_v35  ;;  %v1243_v54 = vadd.f32 %v1242_v45, %v570_v7  ;;  %v3571_v39 = vld [vmem:[#allocation11 + $0x150] sm:$0xff]  ;;  %v3561_v43 = vld [vmem:[#allocation11 + $0x100] sm:$0xff] }
 0x165   :  { %2226 = vmatpush.bf16.msra.mxu1 %v3571_v39  ;;  %2209 = vmatpush.bf16.msra.mxu0 %v3561_v43  ;;  %v3578_v43 = vld [vmem:[#allocation11 + $0x188] sm:$0xff] }
 0x166   :  { %v1571_v48 = vmax.f32 %v1295_v40, %v1539_v44  ;;  %v1546_v58 = vmul.f32 0.2, %v1260_v51 }
 0x168   :  { %v1595_v50 = vpack.c.bf16 %v1571_v48, %v1563_v47  ;;  %v1578_v2 = vmax.f32 %v1260_v51, %v1546_v58  ;;  %v3570_v48 = vld [vmem:[#allocation11 + $0x148] sm:$0xff] }
 0x169   :  { %v1297_v53 = vpop.f32.mrf.mxu3  ;;  %v1280_v55 = vpop.f32.mrf.mxu2  ;;  %2227 = vmatpush.bf16.msra.mxu1 %v3570_v48 }
 0x16a   :  { %2153 = vmatmul.bf16.vlgmr.msrb.gmra.mxu1 %v1595_v50  ;;  %v1298_v29 = vadd.f32 %v1297_v53, %v1279_v59  ;;  %v1281_v11 = vadd.f32 %v1280_v55, %v3971_v0  ;;  %v3583_v59 = vld [vmem:[#allocation11 + $0x1b0] sm:$0xff] }
 0x16b   :  { %v1261_v57 = vpop.f32.mrf.mxu1  ;;  %v1311_v1 = vpop.f32.mrf.mxu0  ;;  %2241 = vmatpush.bf16.msra.mxu2 %v3583_v59 }
 0x16c   :  { %v1262_v60 = vadd.f32 %v1261_v57, %v1243_v54  ;;  %v1547_v7 = vmul.f32 0.2, %v1298_v29  ;;  %v1312_v0 = vadd.f32 %v1311_v1, %v3978_v8 }
 0x16d   :  { %2228 = vmatpush.bf16.msra.mxu1 %v3569_v56 }
 0x16e   :  { %v1554_v62 = vmul.f32 0.2, %v1262_v60  ;;  %v1579_v17 = vmax.f32 %v1298_v29, %v1547_v7  ;;  %v3592_v29 = vld [vmem:[#allocation11 + $0x1f8] sm:$0xff] }
 0x16f   :  { %2259 = vmatpush.bf16.msra.mxu3 %v3592_v29  ;;  %2242 = vmatpush.bf16.msra.mxu2 %v3582_v4 }
 0x170   :  { %v1586_v3 = vmax.f32 %v1262_v60, %v1554_v62 }
 0x171   :  { %v1299_v6 = vpop.f32.mrf.mxu3  ;;  %v1349_v33 = vpop.f32.mrf.mxu2 }
 0x172   :  { %v1300_v9 = vadd.f32 %v1299_v6, %v1281_v11  ;;  %v1602_v10 = vpack.c.bf16 %v1586_v3, %v1578_v2  ;;  %v1350_v31 = vadd.f32 %v1349_v33, %v3982_v21 }
 0x173   :  { %v1330_v13 = vpop.f32.mrf.mxu1  ;;  %v1313_v15 = vpop.f32.mrf.mxu0  ;;  %2243 = vmatpush.bf16.msra.mxu2 %v3581_v12 }
 0x174   :  { %v1555_v14 = vmul.f32 0.2, %v1300_v9  ;;  %2139 = vmatmul.bf16.gmra.mxu0 %v1602_v10  ;;  %v1331_v20 = vadd.f32 %v1330_v13, %v1312_v0  ;;  %v1314_v25 = vadd.f32 %v1313_v15, %v3978_v8  ;;  %v3992_v15 = vperm.slane %v3967_v5, 4 }
 0x176   :  { %v1587_v18 = vmax.f32 %v1300_v9, %v1555_v14  ;;  %v1532_v30 = vmul.f32 0.2, %v1331_v20  ;;  %v3591_v9 = vld [vmem:[#allocation11 + $0x1f0] sm:$0xff] }
 0x177   :  { %2260 = vmatpush.bf16.msra.mxu3 %v3591_v9  ;;  %2244 = vmatpush.bf16.msra.mxu2 %v3580_v23 }
 0x178   :  { %v1603_v22 = vpack.c.bf16 %v1587_v18, %v1579_v17  ;;  %v1564_v40 = vmax.f32 %v1331_v20, %v1532_v30  ;;  %v3590_v18 = vld [vmem:[#allocation11 + $0x1e8] sm:$0xff] }
 0x179   :  { %v1368_v24 = vpop.f32.mrf.mxu3  ;;  %v1351_v26 = vpop.f32.mrf.mxu2 }
 0x17a   :  { %2158 = vmatmul.bf16.gmra.mxu1 %v1603_v22  ;;  %v1369_v37 = vadd.f32 %v1368_v24, %v1350_v31  ;;  %v1352_v42 = vadd.f32 %v1351_v26, %v3982_v21  ;;  %v3589_v26 = vld [vmem:[#allocation11 + $0x1e0] sm:$0xff]  ;;  %v3579_v31 = vld [vmem:[#allocation11 + $0x190] sm:$0xff] }
 0x17b   :  { %v1332_v28 = vpop.f32.mrf.mxu1  ;;  %v1316_v34 = vpop.f32.mrf.mxu0  ;;  %2261 = vmatpush.bf16.msra.mxu3 %v3590_v18  ;;  %2245 = vmatpush.bf16.msra.mxu2 %v3579_v31 }
 0x17c   :  { %v1333_v32 = vadd.f32 %v1332_v28, %v1314_v25  ;;  %v1533_v45 = vmul.f32 0.2, %v1369_v37  ;;  %v1317_v54 = vadd.f32 %v1316_v34, %v3978_v8  ;;  %v575_v28 = vperm.slane %v3967_v5, 5 }
 0x17e   :  { %v1540_v38 = vmul.f32 0.2, %v1333_v32  ;;  %v1565_v53 = vmax.f32 %v1369_v37, %v1533_v45  ;;  %v3588_v37 = vld [vmem:[#allocation11 + $0x1d8] sm:$0xff] }
 0x17f   :  { %2262 = vmatpush.bf16.msra.mxu3 %v3589_v26  ;;  %2246 = vmatpush.bf16.msra.mxu2 %v3578_v43  ;;  %v577_v26 = vperm.slane %v3967_v5, 7 }
 0x180   :  { %v1572_v41 = vmax.f32 %v1333_v32, %v1540_v38 }
 0x181   :  { %v1370_v44 = vpop.f32.mrf.mxu3  ;;  %v1354_v35 = vpop.f32.mrf.mxu2 }
 0x182   :  { %v1596_v46 = vpack.c.bf16 %v1572_v41, %v1564_v40  ;;  %v1371_v47 = vadd.f32 %v1370_v44, %v1352_v42  ;;  %v1355_v2 = vadd.f32 %v1354_v35, %v3982_v21 }
 0x183   :  { %v1335_v49 = vpop.f32.mrf.mxu1  ;;  %v1318_v51 = vpop.f32.mrf.mxu0  ;;  %2263 = vmatpush.bf16.msra.mxu3 %v3588_v37 }
 0x184   :  { %v1541_v50 = vmul.f32 0.2, %v1371_v47  ;;  %2172 = vmatmul.bf16.vlgmr.msrb.gmra.mxu2 %v1596_v46  ;;  %v1336_v58 = vadd.f32 %v1335_v49, %v1317_v54  ;;  %v1319_v1 = vadd.f32 %v1318_v51, %v3978_v8  ;;  %v3587_v46 = vld [vmem:[#allocation11 + $0x1d0] sm:$0xff]  ;;  %v3577_v49 = vld [vmem:[#allocation11 + $0x180] sm:$0xff] }
 0x185   :  { %2247 = vmatpush.bf16.msra.mxu2 %v3577_v49 }
 0x186   :  { %v1573_v55 = vmax.f32 %v1371_v47, %v1541_v50  ;;  %v1548_v63 = vmul.f32 0.2, %v1336_v58 }
 0x187   :  { %2264 = vmatpush.bf16.msra.mxu3 %v3587_v46 }
 0x188   :  { %v1597_v57 = vpack.c.bf16 %v1573_v55, %v1565_v53  ;;  %v1580_v33 = vmax.f32 %v1336_v58, %v1548_v63  ;;  %v3586_v55 = vld [vmem:[#allocation11 + $0x1c8] sm:$0xff] }
 0x189   :  { %v1373_v60 = vpop.f32.mrf.mxu3  ;;  %v1356_v61 = vpop.f32.mrf.mxu2 }
 0x18a   :  { %2191 = vmatmul.bf16.vlgmr.msrb.gmra.mxu3 %v1597_v57  ;;  %v1374_v6 = vadd.f32 %v1373_v60, %v1355_v2  ;;  %v1357_v8 = vadd.f32 %v1356_v61, %v3982_v21  ;;  %v3585_v61 = vld [vmem:[#allocation11 + $0x1c0] sm:$0xff] }
 0x18b   :  { %v1337_v62 = vpop.f32.mrf.mxu1  ;;  %v1387_v11 = vpop.f32.mrf.mxu0  ;;  %2265 = vmatpush.bf16.msra.mxu3 %v3586_v55 }
 0x18c   :  { %v1338_v3 = vadd.f32 %v1337_v62, %v1319_v1  ;;  %v1549_v14 = vmul.f32 0.2, %v1374_v6  ;;  %v1388_v21 = vadd.f32 %v1387_v11, %v3992_v15 }
 0x18e   :  { %v1556_v7 = vmul.f32 0.2, %v1338_v3  ;;  %v1581_v24 = vmax.f32 %v1374_v6, %v1549_v14 }
 0x18f   :  { %2266 = vmatpush.bf16.msra.mxu3 %v3585_v61 }
 0x190   :  { %v1588_v10 = vmax.f32 %v1338_v3, %v1556_v7 }
 0x191   :  { %v1375_v13 = vpop.f32.mrf.mxu3  ;;  %v1425_v17 = vpop.f32.mrf.mxu2 }
 0x192   :  { %v1376_v16 = vadd.f32 %v1375_v13, %v1357_v8  ;;  %v1604_v0 = vpack.c.bf16 %v1588_v10, %v1580_v33  ;;  %v1426_v40 = vadd.f32 %v1425_v17, %v575_v28  ;;  %v576_v17 = vperm.slane %v3967_v5, 6 }
 0x193   :  { %v1406_v19 = vpop.f32.mrf.mxu1  ;;  %v1389_v22 = vpop.f32.mrf.mxu0 }
 0x194   :  { %v1557_v20 = vmul.f32 0.2, %v1376_v16  ;;  %2177 = vmatmul.bf16.gmra.mxu2 %v1604_v0  ;;  %v1407_v27 = vadd.f32 %v1406_v19, %v1388_v21  ;;  %v1390_v34 = vadd.f32 %v1389_v22, %v3992_v15 }
 0x196   :  { %v1589_v25 = vmax.f32 %v1376_v16, %v1557_v20  ;;  %v1534_v39 = vmul.f32 0.2, %v1407_v27 }
 0x198   :  { %v1605_v30 = vpack.c.bf16 %v1589_v25, %v1581_v24  ;;  %v1566_v47 = vmax.f32 %v1407_v27, %v1534_v39 }
 0x199   :  { %v1444_v32 = vpop.f32.mrf.mxu3  ;;  %v1427_v36 = vpop.f32.mrf.mxu2 }
 0x19a   :  { %2196 = vmatmul.bf16.gmra.mxu3 %v1605_v30  ;;  %v1445_v44 = vadd.f32 %v1444_v32, %v1426_v40  ;;  %v1428_v48 = vadd.f32 %v1427_v36, %v575_v28 }
 0x19b   :  { %v1408_v38 = vpop.f32.mrf.mxu1  ;;  %v1392_v42 = vpop.f32.mrf.mxu0 }
 0x19c   :  { %v1409_v41 = vadd.f32 %v1408_v38, %v1390_v34  ;;  %v1535_v51 = vmul.f32 0.2, %v1445_v44  ;;  %v1393_v60 = vadd.f32 %v1392_v42, %v3992_v15 }
 0x19e   :  { %v1542_v45 = vmul.f32 0.2, %v1409_v41  ;;  %v1567_v59 = vmax.f32 %v1445_v44, %v1535_v51 }
 0x1a0   :  { %v1574_v35 = vmax.f32 %v1409_v41, %v1542_v45 }
 0x1a1   :  { %v1446_v50 = vpop.f32.mrf.mxu3  ;;  %v1430_v54 = vpop.f32.mrf.mxu2 }
 0x1a2   :  { %v1598_v52 = vpack.c.bf16 %v1574_v35, %v1566_v47  ;;  %v1447_v53 = vadd.f32 %v1446_v50, %v1428_v48  ;;  %v1431_v6 = vadd.f32 %v1430_v54, %v575_v28 }
 0x1a3   :  { %v1411_v56 = vpop.f32.mrf.mxu1  ;;  %v1394_v58 = vpop.f32.mrf.mxu0 }
 0x1a4   :  { %v1543_v57 = vmul.f32 0.2, %v1447_v53  ;;  %2210 = vmatmul.bf16.vlgmr.msra.gmra.mxu0 %v1598_v52  ;;  %v1412_v62 = vadd.f32 %v1411_v56, %v1393_v60  ;;  %v1395_v2 = vadd.f32 %v1394_v58, %v3992_v15 }
 0x1a6   :  { %v1575_v1 = vmax.f32 %v1447_v53, %v1543_v57  ;;  %v1550_v4 = vmul.f32 0.2, %v1412_v62 }
 0x1a8   :  { %v1599_v29 = vpack.c.bf16 %v1575_v1, %v1567_v59  ;;  %v1582_v8 = vmax.f32 %v1412_v62, %v1550_v4 }
 0x1a9   :  { %v1449_v63 = vpop.f32.mrf.mxu3  ;;  %v1432_v3 = vpop.f32.mrf.mxu2 }
 0x1aa   :  { %2229 = vmatmul.bf16.vlgmr.msra.gmra.mxu1 %v1599_v29  ;;  %v1450_v33 = vadd.f32 %v1449_v63, %v1431_v6  ;;  %v1433_v13 = vadd.f32 %v1432_v3, %v575_v28 }
 0x1ab   :  { %v1413_v11 = vpop.f32.mrf.mxu1  ;;  %v1463_v9 = vpop.f32.mrf.mxu0 }
 0x1ac   :  { %v1414_v7 = vadd.f32 %v1413_v11, %v1395_v2  ;;  %v1551_v16 = vmul.f32 0.2, %v1450_v33  ;;  %v1464_v24 = vadd.f32 %v1463_v9, %v576_v17 }
 0x1ae   :  { %v1558_v10 = vmul.f32 0.2, %v1414_v7  ;;  %v1583_v23 = vmax.f32 %v1450_v33, %v1551_v16 }
 0x1b0   :  { %v1590_v12 = vmax.f32 %v1414_v7, %v1558_v10 }
 0x1b1   :  { %v1451_v14 = vpop.f32.mrf.mxu3  ;;  %v1501_v18 = vpop.f32.mrf.mxu2 }
 0x1b2   :  { %v1452_v0 = vadd.f32 %v1451_v14, %v1433_v13  ;;  %v1606_v19 = vpack.c.bf16 %v1590_v12, %v1582_v8  ;;  %v1502_v36 = vadd.f32 %v1501_v18, %v577_v26 }
 0x1b3   :  { %v1482_v15 = vpop.f32.mrf.mxu1  ;;  %v1465_v22 = vpop.f32.mrf.mxu0 }
 0x1b4   :  { %v1559_v20 = vmul.f32 0.2, %v1452_v0  ;;  %2215 = vmatmul.bf16.gmra.mxu0 %v1606_v19  ;;  %v1483_v25 = vadd.f32 %v1482_v15, %v1464_v24  ;;  %v1466_v28 = vadd.f32 %v1465_v22, %v576_v17 }
 0x1b6   :  { %v1591_v21 = vmax.f32 %v1452_v0, %v1559_v20  ;;  %v1536_v34 = vmul.f32 0.2, %v1483_v25 }
 0x1b8   :  { %v1607_v27 = vpack.c.bf16 %v1591_v21, %v1583_v23  ;;  %v1568_v41 = vmax.f32 %v1483_v25, %v1536_v34  ;;  %v3612_v21 = vld [vmem:[%s4022_s6] ss:$0 sm:$0xff] }
 0x1b9   :  { %v1520_v30 = vpop.f32.mrf.mxu3  ;;  %v1503_v31 = vpop.f32.mrf.mxu2 }
 0x1ba   :  { %2234 = vmatmul.bf16.gmra.mxu1 %v1607_v27  ;;  %v1521_v39 = vadd.f32 %v1520_v30, %v1502_v36  ;;  %v1504_v43 = vadd.f32 %v1503_v31, %v577_v26 }
 0x1bb   :  { %v1484_v32 = vpop.f32.mrf.mxu1  ;;  %v1468_v38 = vpop.f32.mrf.mxu0 }
 0x1bc   :  { %v1485_v37 = vadd.f32 %v1484_v32, %v1466_v28  ;;  %v1537_v45 = vmul.f32 0.2, %v1521_v39  ;;  %v1469_v50 = vadd.f32 %v1468_v38, %v576_v17 }
 0x1be   :  { %v1544_v40 = vmul.f32 0.2, %v1485_v37  ;;  %v1569_v49 = vmax.f32 %v1521_v39, %v1537_v45 }
 0x1c0   :  { %v1576_v42 = vmax.f32 %v1485_v37, %v1544_v40 }
 0x1c1   :  { %v1522_v44 = vpop.f32.mrf.mxu3  ;;  %v1506_v35 = vpop.f32.mrf.mxu2 }
 0x1c2   :  { %v1600_v46 = vpack.c.bf16 %v1576_v42, %v1568_v41  ;;  %v1523_v47 = vadd.f32 %v1522_v44, %v1504_v43  ;;  %v1507_v59 = vadd.f32 %v1506_v35, %v577_v26 }
 0x1c3   :  { %v1487_v5 = vpop.f32.mrf.mxu1  ;;  %v1470_v52 = vpop.f32.mrf.mxu0 }
 0x1c4   :  { %v1545_v48 = vmul.f32 0.2, %v1523_v47  ;;  %2248 = vmatmul.bf16.vlgmr.msra.gmra.mxu2 %v1600_v46  ;;  %v1488_v54 = vadd.f32 %v1487_v5, %v1469_v50  ;;  %v1471_v56 = vadd.f32 %v1470_v52, %v576_v17  ;;  %v3613_v50 = vld [vmem:[%s4023_s7] ss:$0 sm:$0xff]  ;;  %s3821_s7 = smov [#allocation12]  }
 0x1c5   :  { %s2414_s25 = sshll.u32 %s3821_s7, 4  ;;  %s2415_s25 = int_to_ptr.vmem [resolvable:$true] %s2414_s25 }
 0x1c6   :  { %v1577_v51 = vmax.f32 %v1523_v47, %v1545_v48  ;;  %v1552_v58 = vmul.f32 0.2, %v1488_v54  ;;  %2422 = dma.vmem_to_hbm [thread:$0]  %s2415_s25, 1024, %s2417_s1, [#allocation5], %s3822_s28, %s3822_s28, %s3823_s29  }
 0x1c8   :  { %v1601_v53 = vpack.c.bf16 %v1577_v51, %v1569_v49  ;;  %v1584_v62 = vmax.f32 %v1488_v54, %v1552_v58 }
 0x1c9   :  { %v1525_v55 = vpop.f32.mrf.mxu3  ;;  %v1508_v1 = vpop.f32.mrf.mxu2 }
 0x1ca   :  { %2267 = vmatmul.bf16.vlgmr.msra.gmra.mxu3 %v1601_v53  ;;  %v1526_v61 = vadd.f32 %v1525_v55, %v1507_v59  ;;  %v1509_v2 = vadd.f32 %v1508_v1, %v577_v26 }
 0x1cb   :  { %v1489_v57 = vpop.f32.mrf.mxu1 }
 0x1cc   :  { %v1490_v60 = vadd.f32 %v1489_v57, %v1471_v56  ;;  %v1553_v11 = vmul.f32 0.2, %v1526_v61 }
 0x1ce   :  { %v1560_v29 = vmul.f32 0.2, %v1490_v60  ;;  %v1585_v9 = vmax.f32 %v1526_v61, %v1553_v11 }
 0x1d0   :  { %v1592_v63 = vmax.f32 %v1490_v60, %v1560_v29 }
 0x1d1   :  { %v1527_v3 = vpop.f32.mrf.mxu3 }
 0x1d2   :  { %v1528_v4 = vadd.f32 %v1527_v3, %v1509_v2  ;;  %v1608_v6 = vpack.c.bf16 %v1592_v63, %v1584_v62 }
 0x1d4   :  { %v1561_v7 = vmul.f32 0.2, %v1528_v4  ;;  %2253 = vmatmul.bf16.gmra.mxu2 %v1608_v6 }
 0x1d6   :  { %v1593_v33 = vmax.f32 %v1528_v4, %v1561_v7 }
 0x1d8   :  { %v1609_v10 = vpack.c.bf16 %v1593_v33, %v1585_v9 }
 0x1da   :  { %2272 = vmatmul.bf16.gmra.mxu3 %v1609_v10 }
 0x1e1   :  { %v2135_v8 = vpop.f32.mrf.mxu0 }
 0x1e2   :  { %v2136_v27 = vadd.f32 %v3612_v21, %v2135_v8 }
 0x1e7   :  { %v2154_v12 = vpop.f32.mrf.mxu1 }
 0x1e8   :  { %v2155_v28 = vadd.f32 %v2154_v12, %v2136_v27 }
 0x1e9   :  { %v2137_v14 = vpop.f32.mrf.mxu0 }
 0x1ea   :  { %v2138_v37 = vadd.f32 %v3612_v21, %v2137_v14 }
 0x1ef   :  { %v2156_v16 = vpop.f32.mrf.mxu1 }
 0x1f0   :  { %v2157_v40 = vadd.f32 %v2156_v16, %v2138_v37 }
 0x1f1   :  { %v2140_v18 = vpop.f32.mrf.mxu0 }
 0x1f2   :  { %v2141_v35 = vadd.f32 %v3612_v21, %v2140_v18 }
 0x1f7   :  { %v2159_v19 = vpop.f32.mrf.mxu1 }
 0x1f8   :  { %v2160_v51 = vadd.f32 %v2159_v19, %v2141_v35 }
 0x1f9   :  { %v2142_v22 = vpop.f32.mrf.mxu0 }
 0x1fa   :  { %v2143_v29 = vadd.f32 %v3612_v21, %v2142_v22  ;;  %v3614_v21 = vld [vmem:[#allocation2] ss:$0 sm:$0xff] }
 0x1ff   :  { %v2161_v23 = vpop.f32.mrf.mxu1 }
 0x200   :  { %v2162_v2 = vadd.f32 %v2161_v23, %v2143_v29 }
 0x207   :  { %v2173_v13 = vpop.f32.mrf.mxu2 }
 0x208   :  { %v2174_v31 = vadd.f32 %v2173_v13, %v2155_v28 }
 0x20d   :  { %v2192_v17 = vpop.f32.mrf.mxu3 }
 0x20e   :  { %v2193_v34 = vadd.f32 %v2192_v17, %v2174_v31 }
 0x20f   :  { %v2175_v0 = vpop.f32.mrf.mxu2 }
 0x210   :  { %v2176_v43 = vadd.f32 %v2175_v0, %v2157_v40 }
 0x215   :  { %v2194_v15 = vpop.f32.mrf.mxu3 }
 0x216   :  { %v2195_v46 = vadd.f32 %v2194_v15, %v2176_v43 }
 0x217   :  { %v2178_v20 = vpop.f32.mrf.mxu2 }
 0x218   :  { %v2179_v55 = vadd.f32 %v2178_v20, %v2160_v51 }
 0x21d   :  { %v2197_v24 = vpop.f32.mrf.mxu3 }
 0x21e   :  { %v2198_v60 = vadd.f32 %v2197_v24, %v2179_v55 }
 0x21f   :  { %v2180_v25 = vpop.f32.mrf.mxu2 }
 0x220   :  { %v2181_v4 = vadd.f32 %v2180_v25, %v2162_v2  ;;  %v3820_v25 = vmov 0  }
 0x221   :  { %v2211_v26 = vpop.f32.mrf.mxu0  ;;  %3609 = vset.pattern.permute.xlu2 %v3820_v25  ;;  %3610 = vset.pattern.permute.xlu0 %v3820_v25 }
 0x222   :  { %v2212_v38 = vadd.f32 %v2211_v26, %v2193_v34  ;;  %3611 = vset.pattern.permute.xlu1 %v3820_v25 }
 0x225   :  { %v2199_v32 = vpop.f32.mrf.mxu3 }
 0x226   :  { %v2200_v10 = vadd.f32 %v2199_v32, %v2181_v4 }
 0x227   :  { %v2230_v30 = vpop.f32.mrf.mxu1 }
 0x228   :  { %v2231_v41 = vadd.f32 %v2230_v30, %v2212_v38 }
 0x229   :  { %v2213_v39 = vpop.f32.mrf.mxu0 }
 0x22a   :  { %v2214_v48 = vadd.f32 %v2213_v39, %v2195_v46 }
 0x22f   :  { %v2232_v42 = vpop.f32.mrf.mxu1 }
 0x230   :  { %v2233_v52 = vadd.f32 %v2232_v42, %v2214_v48 }
 0x231   :  { %v2216_v54 = vpop.f32.mrf.mxu0 }
 0x232   :  { %v2217_v62 = vadd.f32 %v2216_v54, %v2198_v60 }
 0x237   :  { %v2235_v58 = vpop.f32.mrf.mxu1 }
 0x238   :  { %v2236_v3 = vadd.f32 %v2235_v58, %v2217_v62 }
 0x239   :  { %v2218_v9 = vpop.f32.mrf.mxu0 }
 0x23a   :  { %v2219_v13 = vadd.f32 %v2218_v9, %v2200_v10 }
 0x23f   :  { %v2237_v12 = vpop.f32.mrf.mxu1 }
 0x240   :  { %v2238_v17 = vadd.f32 %v2237_v12, %v2219_v13 }
 0x247   :  { %v2249_v36 = vpop.f32.mrf.mxu2 }
 0x248   :  { %v2250_v44 = vadd.f32 %v2249_v36, %v2231_v41 }
 0x24d   :  { %v2268_v45 = vpop.f32.mrf.mxu3 }
 0x24e   :  { %v2269_v47 = vadd.f32 %v2268_v45, %v2250_v44 }
 0x24f   :  { %v2251_v5 = vpop.f32.mrf.mxu2 }
 0x250   :  { %v2278_v49 = vmul.f32 0.2, %v2269_v47  ;;  %v2252_v56 = vadd.f32 %v2251_v5, %v2233_v52 }
 0x252   :  { %v2282_v53 = vmax.f32 %v2269_v47, %v2278_v49 }
 0x254   :  { %v2290_v57 = vmul.f32 %v3613_v50, %v2282_v53 }
 0x255   :  { %v2270_v59 = vpop.f32.mrf.mxu3 }
 0x256   :  { %v2271_v1 = vadd.f32 %v2270_v59, %v2252_v56  ;;  %2294 = vadd.xlane.f32.xlu0 %v2290_v57 }
 0x257   :  { %v2254_v61 = vpop.f32.mrf.mxu2 }
 0x258   :  { %v2279_v63 = vmul.f32 0.2, %v2271_v1  ;;  %v2255_v6 = vadd.f32 %v2254_v61, %v2236_v3 }
 0x25a   :  { %v2283_v11 = vmax.f32 %v2271_v1, %v2279_v63 }
 0x25c   :  { %v2291_v7 = vmul.f32 %v3613_v50, %v2283_v11 }
 0x25d   :  { %v2273_v33 = vpop.f32.mrf.mxu3 }
 0x25e   :  { %v2274_v8 = vadd.f32 %v2273_v33, %v2255_v6  ;;  %2296 = vadd.xlane.f32.xlu0 %v2291_v7 }
 0x25f   :  { %v2256_v16 = vpop.f32.mrf.mxu2 }
 0x260   :  { %v2280_v14 = vmul.f32 0.2, %v2274_v8  ;;  %v2257_v18 = vadd.f32 %v2256_v16, %v2238_v17 }
 0x262   :  { %v2284_v0 = vmax.f32 %v2274_v8, %v2280_v14 }
 0x264   :  { %v2292_v19 = vmul.f32 %v3613_v50, %v2284_v0 }
 0x265   :  { %v2275_v15 = vpop.f32.mrf.mxu3 }
 0x266   :  { %v2276_v20 = vadd.f32 %v2275_v15, %v2257_v18  ;;  %2298 = vadd.xlane.f32.xlu1 %v2292_v19 }
 0x268   :  { %v2281_v22 = vmul.f32 0.2, %v2276_v20 }
 0x26a   :  { %v2285_v23 = vmax.f32 %v2276_v20, %v2281_v22 }
 0x26c   :  { %v2293_v24 = vmul.f32 %v3613_v50, %v2285_v23 }
 0x26e   :  { %2300 = vadd.xlane.f32.xlu1 %v2293_v24 }
 0x2c9   :  { %v2295_v26 = vpop.xlane.xlu0 %2294 }
 0x2ca   :  { %v2306_v27 = vadd.f32 %v3614_v21, %v2295_v26 }
 0x2cc   :  { %v3361_v30 = vmul.f32 -1.442695, %v2306_v27 }
 0x2ce   :  { %3615 = vpow2.f32 %v3361_v30 }
 0x2d1   :  { %v2297_v28 = vpop.xlane.xlu0 %2296 }
 0x2d2   :  { %v2307_v31 = vadd.f32 %v3614_v21, %v2297_v28 }
 0x2d4   :  { %v3616_v32 = vpop.eup %3615  ;;  %v3362_v34 = vmul.f32 -1.442695, %v2307_v31 }
 0x2d5   :  { %v2322_v36 = vadd.f32 1.0, %v3616_v32 }
 0x2d6   :  { %3617 = vpow2.f32 %v3362_v34 }
 0x2d7   :  { %3619 = vrcp.f32 %v2322_v36  ;;  %v2337_v46 = vand.u32 2147483648, %v2322_v36  ;;  %v2335_v35 = vand.u32 2147483647, %v2322_v36  ;;  %vm2331_vm1 = vweird.f32 %v2322_v36 }
 0x2d9   :  { %v2299_v37 = vpop.xlane.xlu1 %2298  ;;  %v2338_v53 = vor.u32 1.1754944e-38, %v2337_v46  ;;  %vm2336_vm3 = vcmp.eq.f32.partialorder %v2335_v35, 8.507059e+37 }
 0x2da   :  { %v2308_v38 = vadd.f32 %v3614_v21, %v2299_v37 }
 0x2dc   :  { %v3618_v39 = vpop.eup %3617  ;;  %v3363_v40 = vmul.f32 -1.442695, %v2308_v38 }
 0x2dd   :  { %v3620_v41 = vpop.eup %3619  ;;  %v2323_v42 = vadd.f32 1.0, %v3618_v39 }
 0x2de   :  { %3621 = vpow2.f32 %v3363_v40  ;;  %v2327_v43 = vmul.f32 %v3620_v41, %v2322_v36  ;;  %vm2332_vm0 = vweird.f32 %v3620_v41 }
 0x2df   :  { %3623 = vrcp.f32 %v2323_v42  ;;  %vm2333_vm2 = vmor %vm2331_vm1, %vm2332_vm0  ;;  %v2352_v58 = vand.u32 2147483648, %v2323_v42  ;;  %v2350_v60 = vand.u32 2147483647, %v2323_v42  ;;  %vm2346_vm5 = vweird.f32 %v2323_v42 }
 0x2e0   :  { %v2328_v44 = vsub.f32 1.0, %v2327_v43 }
 0x2e1   :  { %v2301_v45 = vpop.xlane.xlu1 %2300  ;;  %v2353_v63 = vor.u32 1.1754944e-38, %v2352_v58  ;;  %vm2351_vm7 = vcmp.eq.f32.partialorder %v2350_v60, 8.507059e+37 }
 0x2e2   :  { %v2309_v47 = vadd.f32 %v3614_v21, %v2301_v45  ;;  %v2329_v5 = vmul.f32 %v3620_v41, %v2328_v44 }
 0x2e4   :  { %v3622_v48 = vpop.eup %3621  ;;  %v3364_v49 = vmul.f32 -1.442695, %v2309_v47  ;;  %v2330_v50 = vadd.f32 %v3620_v41, %v2329_v5 }
 0x2e5   :  { %v3624_v51 = vpop.eup %3623  ;;  %v2324_v52 = vadd.f32 1.0, %v3622_v48 }
 0x2e6   :  { %3625 = vpow2.f32 %v3364_v49  ;;  %v2334_v54 = vsel %vm2333_vm2, %v3620_v41, %v2330_v50  ;;  %v2342_v55 = vmul.f32 %v3624_v51, %v2323_v42  ;;  %vm2347_vm4 = vweird.f32 %v3624_v51 }
 0x2e7   :  { %3627 = vrcp.f32 %v2324_v52  ;;  %v2339_v56 = vsel %vm2336_vm3, %v2338_v53, %v2334_v54  ;;  %vm2348_vm6 = vmor %vm2346_vm5, %vm2347_vm4  ;;  %v2367_v6 = vand.u32 2147483648, %v2324_v52  ;;  %v2365_v9 = vand.u32 2147483647, %v2324_v52 }
 0x2e8   :  { %2388 = vperm.xlu2 %3609, %v2339_v56   ;;  %v2343_v57 = vsub.f32 1.0, %v2342_v55  ;;  %vm2361_vm9 = vweird.f32 %v2324_v52 }
 0x2e9   :  { %v2368_v8 = vor.u32 1.1754944e-38, %v2367_v6  ;;  %vm2366_vm11 = vcmp.eq.f32.partialorder %v2365_v9, 8.507059e+37 }
 0x2ea   :  { %v2344_v59 = vmul.f32 %v3624_v51, %v2343_v57 }
 0x2ec   :  { %v3626_v1 = vpop.eup %3625  ;;  %v2345_v61 = vadd.f32 %v3624_v51, %v2344_v59 }
 0x2ed   :  { %v3628_v29 = vpop.eup %3627  ;;  %v2325_v62 = vadd.f32 1.0, %v3626_v1 }
 0x2ee   :  { %v2349_v2 = vsel %vm2348_vm6, %v3624_v51, %v2345_v61  ;;  %v2357_v3 = vmul.f32 %v3628_v29, %v2324_v52  ;;  %vm2362_vm8 = vweird.f32 %v3628_v29 }
 0x2ef   :  { %3629 = vrcp.f32 %v2325_v62  ;;  %v2354_v11 = vsel %vm2351_vm7, %v2353_v63, %v2349_v2  ;;  %vm2363_vm10 = vmor %vm2361_vm9, %vm2362_vm8  ;;  %v2382_v17 = vand.u32 2147483648, %v2325_v62  ;;  %v2380_v18 = vand.u32 2147483647, %v2325_v62 }
 0x2f0   :  { %2393 = vperm.xlu2 %3609, %v2354_v11   ;;  %v2358_v4 = vsub.f32 1.0, %v2357_v3  ;;  %vm2376_vm13 = vweird.f32 %v2325_v62 }
 0x2f1   :  { %v2383_v15 = vor.u32 1.1754944e-38, %v2382_v17  ;;  %vm2381_vm15 = vcmp.eq.f32.partialorder %v2380_v18, 8.507059e+37 }
 0x2f2   :  { %v2359_v7 = vmul.f32 %v3628_v29, %v2358_v4 }
 0x2f4   :  { %v2360_v33 = vadd.f32 %v3628_v29, %v2359_v7 }
 0x2f5   :  { %v3630_v10 = vpop.eup %3629 }
 0x2f6   :  { %v2364_v12 = vsel %vm2363_vm10, %v3628_v29, %v2360_v33  ;;  %v2372_v13 = vmul.f32 %v3630_v10, %v2325_v62  ;;  %vm2377_vm12 = vweird.f32 %v3630_v10 }
 0x2f7   :  { %v2369_v14 = vsel %vm2366_vm11, %v2368_v8, %v2364_v12  ;;  %vm2378_vm14 = vmor %vm2376_vm13, %vm2377_vm12 }
 0x2f8   :  { %2398 = vperm.xlu0 %3610, %v2369_v14   ;;  %v2373_v16 = vsub.f32 1.0, %v2372_v13 }
 0x2fa   :  { %v2374_v0 = vmul.f32 %v3630_v10, %v2373_v16 }
 0x2fc   :  { %v2375_v19 = vadd.f32 %v3630_v10, %v2374_v0 }
 0x2fe   :  { %v2379_v20 = vsel %vm2378_vm14, %v3630_v10, %v2375_v19 }
 0x2ff   :  { %v2384_v22 = vsel %vm2381_vm15, %v2383_v15, %v2379_v20 }
 0x300   :  { %2403 = vperm.xlu1 %3611, %v2384_v22  }
 0x342   :  { %v2389_v23 = vpop.permute.xlu2 %2388 }
 0x343   :  { %2406 = vst [vmem:[#allocation13] sm:$0xff] %v2389_v23 }
 0x34a   :  { %v2394_v24 = vpop.permute.xlu2 %2393 }
 0x34b   :  { %2407 = vst [vmem:[#allocation13 + $0x8] sm:$0xff] %v2394_v24 }
 0x36a   :  { %v2399_v21 = vpop.permute.xlu0 %2398 }
 0x36b   :  { %2408 = vst [vmem:[#allocation13 + $0x10] sm:$0xff] %v2399_v21 }
 0x372   :  { %v2404_v25 = vpop.permute.xlu1 %2403 }
 0x373   :  { %2409 = vst [vmem:[#allocation13 + $0x18] sm:$0xff] %v2404_v25 }
 0x374   :  { %2435 = dma.vmem_to_hbm [thread:$0]  %s2428_s4, 512, %s2430_s12, [#allocation14], %s3810_s23, %s3810_s23, %s3811_s8  }
 0x375   :  { %3805 = dma.done.wait [#allocation5], 1024  }
 0x376   :  { %3806 = vsyncadd [#allocation5], 4294966272 }
 0x377   :  { %3807 = dma.done.wait [#allocation14], 512  }
 0x378   :  { %3808 = vsyncadd [#allocation14], 4294966784 }
 0x379   :  { %2444 = vsyncpa [#allocation4], 1 }
 0x37a   :  { %2445 = vsyncpa [#allocation7], 1 }
 0x37b   :  { %2446 = vsyncpa [#allocation10], 1 }
 0x37c   :  { %2447 = vsyncpa [#allocation5], 1 }
 0x37d   :  { %2448 = vsyncpa [#allocation14], 1 }

</bundles_post_ra>
